<compile_context>
chip_gen: v5e
topology: v5e:2x2
jax: 0.10.0
libtpu: 0.0.40
codegen_flags: <defaults>
</compile_context>

<pallas_src>
import functools

import jax
import jax.numpy as jnp
from jax import lax
from jax.experimental import pallas as pl
from jax.experimental.pallas import tpu as pltpu


# --------------------------------- kernel -----------------------------------
def _ahpc_kernel(x_ref, w1_ref, b1_ref, wf_ref, b2_ref, wro_ref, w3_ref, b3_ref,
                 out_ref,
                 cur1_s, cur3_s, rs_s, lhs_s, mem1, rmem, amem, aspk, mem2,
                 *, batch, n_h1, n_h2, tt, beta, back_beta, thresh, unroll):
    B = batch

    # Zero all carried state on the first time tile (utils.reset equivalent).
    @pl.when(pl.program_id(0) == 0)
    def _():
        mem1[...] = jnp.zeros_like(mem1)
        rmem[...] = jnp.zeros_like(rmem)
        amem[...] = jnp.zeros_like(amem)
        aspk[...] = jnp.zeros_like(aspk)
        mem2[...] = jnp.zeros_like(mem2)
        lhs_s[...] = jnp.zeros_like(lhs_s)      # prev s1 | prev r_s, both zero

    # ---- hoisted linear1: ONE MXU call for the whole time tile (bias folded).
    cur1_s[...] = jnp.dot(x_ref[...], w1_ref[...],
                          preferred_element_type=jnp.float32) + b1_ref[...]

    # Hoist loop-invariant operands (weights + b2 broadcast) out of the loop.
    wf = wf_ref[...]
    wro = wro_ref[...]
    b2b = jnp.broadcast_to(b2_ref[...], (B, n_h2))

    def step(t, carry):
        row = pl.multiple_of(t * B, 8)                       # B is a multiple of 8

        # Delayed subtract-reset: reset masks are exactly last step's spikes,
        # read from the persistent fused-LHS scratch (no membrane re-compare).
        prev = lhs_s[...]
        reset1 = prev[:, :n_h1].astype(jnp.float32)
        reset_r = prev[:, n_h1:].astype(jnp.float32)

        # ---- leaky1 (linear1 current precomputed for the tile) --------------
        cur1 = cur1_s[pl.ds(row, B), :]
        m1 = beta * mem1[...] + cur1 - reset1 * thresh
        mem1[...] = m1
        s1 = (m1 > thresh).astype(jnp.bfloat16)

        # ---- fused MXU call: [linear2 | recurrent.input_dense] --------------
        # (block-diagonal wf; split back into two matmuls if feature dims ever
        #  exceed one MXU tile: 128 on v5e, 256 on v6e/v7x)
        lhs_s[:, :n_h1] = s1                    # r_s slot still holds prev r_s
        fused = jnp.dot(lhs_s[...], wf, preferred_element_type=jnp.float32)
        cur2 = fused[:, :n_h2] + b2b
        fb_in = fused[:, n_h2:]

        # ---- AHPC feedback path: Leaky(back_beta) -> output_dense ------------
        a_m = back_beta * amem[...] + fb_in - aspk[...] * thresh
        amem[...] = a_m
        a_s = (a_m > thresh).astype(jnp.float32)
        aspk[...] = a_s
        feedback = jnp.dot(a_s.astype(jnp.bfloat16), wro,
                           preferred_element_type=jnp.float32)

        # ---- main recurrent membrane (RLeaky-style, reset_delay=True) --------
        r_m = beta * rmem[...] + cur2 - feedback - reset_r * thresh
        rmem[...] = r_m
        r_sf = (r_m > thresh).astype(jnp.float32)
        rs_s[pl.ds(row, B), :] = r_sf           # tile buffer for deferred linear3
        lhs_s[:, n_h1:] = r_sf.astype(jnp.bfloat16)
        return carry

    lax.fori_loop(0, tt, step, 0, unroll=unroll)

    # ---- deferred linear3 over the whole tile (one batched MXU call + b3) ----
    cur3_s[...] = jnp.dot(rs_s[...].astype(jnp.bfloat16), w3_ref[...],
                          preferred_element_type=jnp.float32) + b3_ref[...]

    # ---- elementwise-only leaky2 recurrence + output spike writes ------------
    def out_step(t, carry):
        row = pl.multiple_of(t * B, 8)
        m2p = mem2[...]
        reset2 = (m2p > thresh).astype(jnp.float32)
        m2 = beta * m2p + cur3_s[pl.ds(row, B), :] - reset2 * thresh
        mem2[...] = m2
        out_ref[pl.ds(row, B), :] = (m2 > thresh).astype(out_ref.dtype)
        return carry

    lax.fori_loop(0, tt, out_step, 0, unroll=unroll)


# -------------------------------- wrapper -----------------------------------
def _choose_time_tile(T, Bp, n_in, n_h1, n_h2, n_out, budget_bytes=8 << 20):
    """Largest time tile that divides T and fits a conservative VMEM budget
    (2x-buffered input/output blocks + tile scratches) on any TPU generation."""
    per_step = Bp * (2 * 2 * n_in + 2 * 4 * n_out            # in / out blocks (x2 bufs)
                     + 4 * n_h1 + 4 * n_out + 4 * n_h2)      # cur1 / cur3 / r_s scratch
    max_tile = max(1, min(128, budget_bytes // max(per_step, 1)))
    if T <= max_tile:
        return T
    for cand in range(max_tile, 0, -1):
        if T % cand == 0:
            return cand
    return T


@functools.partial(jax.jit, static_argnames=("beta", "back_beta", "threshold"))
def ahpc_forward(data, w1, b1, w2, b2, w_rec_in, w_rec_out, w3, b3,
                 *, beta=0.9, back_beta=0.85, threshold=1.0):
    """data: (B, num_inputs, T)  ->  spikes: (T, B, num_outputs) float32 {0,1}."""
    B, n_in, T = data.shape
    n_h1 = w1.shape[0]
    n_h2 = w2.shape[0]
    n_out = w3.shape[0]

    # Pad batch to a sublane multiple so every dynamic in-kernel slice is aligned.
    Bp = ((B + 7) // 8) * 8
    x_tm = jnp.transpose(data, (2, 0, 1))                       # (T, B, n_in)
    if Bp != B:
        x_tm = jnp.pad(x_tm, ((0, 0), (0, Bp - B), (0, 0)))
    # Flatten (time, batch) in the wrapper (avoids an in-kernel relayout).
    x2 = x_tm.reshape(T * Bp, n_in).astype(jnp.bfloat16)

    # Pre-transpose weights so the kernel computes x @ W^T as x @ Wt; bf16 MXU
    # operands with f32 accumulation (state stays f32).
    w1_t = w1.T.astype(jnp.bfloat16)                  # (n_in, n_h1)
    wro_t = w_rec_out.T.astype(jnp.bfloat16)          # (n_h2, n_h2)
    w3_t = w3.T.astype(jnp.bfloat16)                  # (n_h2, n_out)

    # Block-diagonal packing fuses linear2 and recurrent.input_dense into one
    # MXU call per step: [s1 | prev_spk] @ [[w2^T, 0], [0, w_rec_in^T]].
    wf = jnp.zeros((n_h1 + n_h2, 2 * n_h2), jnp.float32)
    wf = wf.at[:n_h1, :n_h2].set(w2.T)
    wf = wf.at[n_h1:, n_h2:].set(w_rec_in.T)
    wf = wf.astype(jnp.bfloat16)

    b1_r = b1.reshape(1, n_h1).astype(jnp.float32)
    b2_r = b2.reshape(1, n_h2).astype(jnp.float32)
    b3_r = b3.reshape(1, n_out).astype(jnp.float32)

    tt = _choose_time_tile(T, Bp, n_in, n_h1, n_h2, n_out)
    grid = (T // tt,)
    unroll = True if tt <= 16 else 8                  # partial unroll for big tiles

    kernel = functools.partial(
        _ahpc_kernel,
        batch=Bp, n_h1=n_h1, n_h2=n_h2, tt=tt,
        beta=float(beta), back_beta=float(back_beta), thresh=float(threshold),
        unroll=unroll,
    )

    const = lambda shape: pl.BlockSpec(shape, lambda i: (0, 0))

    out2 = pl.pallas_call(
        kernel,
        out_shape=jax.ShapeDtypeStruct((T * Bp, n_out), jnp.float32),
        grid_spec=pltpu.PrefetchScalarGridSpec(
            num_scalar_prefetch=0,
            grid=grid,
            in_specs=[
                pl.BlockSpec((tt * Bp, n_in), lambda i: (i, 0)),    # flattened time tile
                const((n_in, n_h1)),                                # w1^T
                const((1, n_h1)),                                   # b1
                const((n_h1 + n_h2, 2 * n_h2)),                     # fused w2 / w_rec_in
                const((1, n_h2)),                                   # b2
                const((n_h2, n_h2)),                                # w_rec_out^T
                const((n_h2, n_out)),                               # w3^T
                const((1, n_out)),                                  # b3
            ],
            out_specs=pl.BlockSpec((tt * Bp, n_out), lambda i: (i, 0)),
            scratch_shapes=[
                pltpu.VMEM((tt * Bp, n_h1), jnp.float32),   # hoisted linear1 currents
                pltpu.VMEM((tt * Bp, n_out), jnp.float32),  # deferred linear3 currents
                pltpu.VMEM((tt * Bp, n_h2), jnp.float32),   # recurrent spikes (whole tile)
                pltpu.VMEM((Bp, n_h1 + n_h2), jnp.bfloat16),# fused LHS = prev [s1 | r_s]
                pltpu.VMEM((Bp, n_h1), jnp.float32),        # leaky1 membrane
                pltpu.VMEM((Bp, n_h2), jnp.float32),        # recurrent membrane
                pltpu.VMEM((Bp, n_h2), jnp.float32),        # AHPC membrane
                pltpu.VMEM((Bp, n_h2), jnp.float32),        # previous AHPC spike
                pltpu.VMEM((Bp, n_out), jnp.float32),       # leaky2 membrane
            ],
        ),
        compiler_params=pltpu.CompilerParams(
            dimension_semantics=("arbitrary",),     # state carried across time tiles
        ),
    )(x2, w1_t, b1_r, wf, b2_r, wro_t, w3_t, b3_r)

    out = out2.reshape(T, Bp, n_out)
    if Bp != B:
        out = out[:, :B, :]
    return out


# --------------------------------- driver -----------------------------------
if __name__ == "__main__":
    key = jax.random.PRNGKey(0)
    B, NUM_INPUTS, NUM_H1, NUM_H2, NUM_OUT, T = 4, 16, 32, 32, 8, 8
    BETA, BACK_BETA, THRESH = 0.9, 0.85, 1.0

    keys = jax.random.split(key, 11)

    def init_linear(kw, kb, fan_out, fan_in):
        bound = 1.0 / jnp.sqrt(jnp.float32(fan_in))
        w = jax.random.uniform(kw, (fan_out, fan_in), jnp.float32, -bound, bound)
        b = jax.random.uniform(kb, (fan_out,), jnp.float32, -bound, bound)
        return w, b

    w1, b1 = init_linear(keys[0], keys[1], NUM_H1, NUM_INPUTS)      # linear1
    w2, b2 = init_linear(keys[2], keys[3], NUM_H2, NUM_H1)          # linear2
    w_rec_in, _ = init_linear(keys[4], keys[5], NUM_H2, NUM_H2)     # recurrent.input_dense
    w_rec_out, _ = init_linear(keys[6], keys[7], NUM_H2, NUM_H2)    # recurrent.output_dense
    w3, b3 = init_linear(keys[8], keys[9], NUM_OUT, NUM_H2)         # linear3

    # input: (batch, num_inputs, time) — same layout the PyTorch forward indexes
    data = jax.random.uniform(keys[10], (B, NUM_INPUTS, T), jnp.float32, 0.0, 2.0)

    spikes = ahpc_forward(data, w1, b1, w2, b2, w_rec_in, w_rec_out, w3, b3,
                          beta=BETA, back_beta=BACK_BETA, threshold=THRESH)
    jax.block_until_ready(spikes)

    assert spikes.shape == (T, B, NUM_OUT)
    assert bool(jnp.all((spikes == 0.0) | (spikes == 1.0)))
    print("KERNEL_OK")
</pallas_src>

<mosaic_0001>
module attributes {stable_mosaic.version = 11 : i64} {
  func.func @_ahpc_kernel(%arg0: i32, %arg1: memref<64x16xbf16, #tpu.memory_space<vmem>>, %arg2: memref<16x32xbf16, #tpu.memory_space<vmem>>, %arg3: memref<1x32xf32, #tpu.memory_space<vmem>>, %arg4: memref<64x64xbf16, #tpu.memory_space<vmem>>, %arg5: memref<1x32xf32, #tpu.memory_space<vmem>>, %arg6: memref<32x32xbf16, #tpu.memory_space<vmem>>, %arg7: memref<32x8xbf16, #tpu.memory_space<vmem>>, %arg8: memref<1x8xf32, #tpu.memory_space<vmem>>, %arg9: memref<64x8xf32, #tpu.memory_space<vmem>>, %arg10: memref<64x32xf32, #tpu.memory_space<vmem>>, %arg11: memref<64x8xf32, #tpu.memory_space<vmem>>, %arg12: memref<64x32xf32, #tpu.memory_space<vmem>>, %arg13: memref<8x64xbf16, #tpu.memory_space<vmem>>, %arg14: memref<8x32xf32, #tpu.memory_space<vmem>>, %arg15: memref<8x32xf32, #tpu.memory_space<vmem>>, %arg16: memref<8x32xf32, #tpu.memory_space<vmem>>, %arg17: memref<8x32xf32, #tpu.memory_space<vmem>>, %arg18: memref<8x8xf32, #tpu.memory_space<vmem>>) attributes {dimension_semantics = [#tpu.dimension_semantics<arbitrary>], iteration_bounds = array<i64: 1>, scalar_prefetch = 0 : i64, scratch_operands = 9 : i64, tpu.core_type = #tpu.core_type<tc>, window_params = [{transform_indices = @transform_0, window_bounds = array<i64: 64, 16>}, {pipeline_mode = #tpu.pipeline_mode<synchronous>, transform_indices = @transform_1, window_bounds = array<i64: 16, 32>}, {pipeline_mode = #tpu.pipeline_mode<synchronous>, transform_indices = @transform_2, window_bounds = array<i64: 1, 32>}, {pipeline_mode = #tpu.pipeline_mode<synchronous>, transform_indices = @transform_3, window_bounds = array<i64: 64, 64>}, {pipeline_mode = #tpu.pipeline_mode<synchronous>, transform_indices = @transform_4, window_bounds = array<i64: 1, 32>}, {pipeline_mode = #tpu.pipeline_mode<synchronous>, transform_indices = @transform_5, window_bounds = array<i64: 32, 32>}, {pipeline_mode = #tpu.pipeline_mode<synchronous>, transform_indices = @transform_6, window_bounds = array<i64: 32, 8>}, {pipeline_mode = #tpu.pipeline_mode<synchronous>, transform_indices = @transform_7, window_bounds = array<i64: 1, 8>}, {transform_indices = @transform_8, window_bounds = array<i64: 64, 8>}]} {
    %c0_i32 = arith.constant 0 : i32
    %0 = arith.cmpi eq, %arg0, %c0_i32 : i32
    %1 = arith.extui %0 : i1 to i32
    %c0_i32_0 = arith.constant 0 : i32
    %2 = arith.cmpi ne, %1, %c0_i32_0 : i32
    scf.if %2 {
      %cst_424 = arith.constant 0.000000e+00 : f32
      %687 = vector.broadcast %cst_424 : f32 to vector<8x32xf32>
      %c0_425 = arith.constant 0 : index
      %c0_426 = arith.constant 0 : index
      %688 = vector.load %arg14[%c0_425, %c0_426] : memref<8x32xf32, #tpu.memory_space<vmem>>, vector<8x32xf32>
      tpu.vector_store %arg14[%c0_425, %c0_426], %687 {strides = array<i32>} : memref<8x32xf32, #tpu.memory_space<vmem>>, vector<8x32xf32>,
      %cst_427 = arith.constant 0.000000e+00 : f32
      %689 = vector.broadcast %cst_427 : f32 to vector<8x32xf32>
      %c0_428 = arith.constant 0 : index
      %c0_429 = arith.constant 0 : index
      %690 = vector.load %arg15[%c0_428, %c0_429] : memref<8x32xf32, #tpu.memory_space<vmem>>, vector<8x32xf32>
      tpu.vector_store %arg15[%c0_428, %c0_429], %689 {strides = array<i32>} : memref<8x32xf32, #tpu.memory_space<vmem>>, vector<8x32xf32>,
      %cst_430 = arith.constant 0.000000e+00 : f32
      %691 = vector.broadcast %cst_430 : f32 to vector<8x32xf32>
      %c0_431 = arith.constant 0 : index
      %c0_432 = arith.constant 0 : index
      %692 = vector.load %arg16[%c0_431, %c0_432] : memref<8x32xf32, #tpu.memory_space<vmem>>, vector<8x32xf32>
      tpu.vector_store %arg16[%c0_431, %c0_432], %691 {strides = array<i32>} : memref<8x32xf32, #tpu.memory_space<vmem>>, vector<8x32xf32>,
      %cst_433 = arith.constant 0.000000e+00 : f32
      %693 = vector.broadcast %cst_433 : f32 to vector<8x32xf32>
      %c0_434 = arith.constant 0 : index
      %c0_435 = arith.constant 0 : index
      %694 = vector.load %arg17[%c0_434, %c0_435] : memref<8x32xf32, #tpu.memory_space<vmem>>, vector<8x32xf32>
      tpu.vector_store %arg17[%c0_434, %c0_435], %693 {strides = array<i32>} : memref<8x32xf32, #tpu.memory_space<vmem>>, vector<8x32xf32>,
      %cst_436 = arith.constant 0.000000e+00 : f32
      %695 = vector.broadcast %cst_436 : f32 to vector<8x8xf32>
      %c0_437 = arith.constant 0 : index
      %c0_438 = arith.constant 0 : index
      %696 = vector.load %arg18[%c0_437, %c0_438] : memref<8x8xf32, #tpu.memory_space<vmem>>, vector<8x8xf32>
      tpu.vector_store %arg18[%c0_437, %c0_438], %695 {strides = array<i32>} : memref<8x8xf32, #tpu.memory_space<vmem>>, vector<8x8xf32>,
      %cst_439 = arith.constant 0.000000e+00 : bf16
      %697 = vector.broadcast %cst_439 : bf16 to vector<8x64xbf16>
      %c0_440 = arith.constant 0 : index
      %c0_441 = arith.constant 0 : index
      %698 = vector.load %arg13[%c0_440, %c0_441] : memref<8x64xbf16, #tpu.memory_space<vmem>>, vector<8x64xbf16>
      tpu.vector_store %arg13[%c0_440, %c0_441], %697 {strides = array<i32>} : memref<8x64xbf16, #tpu.memory_space<vmem>>, vector<8x64xbf16>,
    } else {
    }
    %c0 = arith.constant 0 : index
    %c0_1 = arith.constant 0 : index
    %3 = vector.load %arg1[%c0, %c0_1] : memref<64x16xbf16, #tpu.memory_space<vmem>>, vector<64x16xbf16>
    %c0_2 = arith.constant 0 : index
    %c0_3 = arith.constant 0 : index
    %4 = vector.load %arg2[%c0_2, %c0_3] : memref<16x32xbf16, #tpu.memory_space<vmem>>, vector<16x32xbf16>
    %cst = arith.constant dense<0.000000e+00> : vector<64x32xf32>
    %5 = tpu.matmul %3, %4, %cst {dimension_numbers = #tpu.dot_dimension_numbers<[1], [0], [0], [1], [0, 0, 1, 1], [], []>} : vector<64x16xbf16>, vector<16x32xbf16>, vector<64x32xf32> -> vector<64x32xf32>
    %c0_4 = arith.constant 0 : index
    %c0_5 = arith.constant 0 : index
    %6 = vector.load %arg3[%c0_4, %c0_5] : memref<1x32xf32, #tpu.memory_space<vmem>>, vector<1x32xf32>
    %7 = vector.broadcast %6 : vector<1x32xf32> to vector<64x32xf32>
    %8 = arith.addf %5, %7 : vector<64x32xf32>
    %c0_6 = arith.constant 0 : index
    %c0_7 = arith.constant 0 : index
    %9 = vector.load %arg10[%c0_6, %c0_7] : memref<64x32xf32, #tpu.memory_space<vmem>>, vector<64x32xf32>
    tpu.vector_store %arg10[%c0_6, %c0_7], %8 {strides = array<i32>} : memref<64x32xf32, #tpu.memory_space<vmem>>, vector<64x32xf32>,
    %c0_8 = arith.constant 0 : index
    %c0_9 = arith.constant 0 : index
    %10 = vector.load %arg4[%c0_8, %c0_9] : memref<64x64xbf16, #tpu.memory_space<vmem>>, vector<64x64xbf16>
    %c0_10 = arith.constant 0 : index
    %c0_11 = arith.constant 0 : index
    %11 = vector.load %arg6[%c0_10, %c0_11] : memref<32x32xbf16, #tpu.memory_space<vmem>>, vector<32x32xbf16>
    %c0_12 = arith.constant 0 : index
    %c0_13 = arith.constant 0 : index
    %12 = vector.load %arg5[%c0_12, %c0_13] : memref<1x32xf32, #tpu.memory_space<vmem>>, vector<1x32xf32>
    %13 = vector.shape_cast %12 : vector<1x32xf32> to vector<1x32xf32>
    %14 = vector.broadcast %13 : vector<1x32xf32> to vector<8x32xf32>
    %c0_i32_14 = arith.constant 0 : i32
    %c8_i32 = arith.constant 8 : i32
    %15 = arith.muli %c0_i32_14, %c8_i32 : i32
    %16 = tpu.assume_multiple %15, 8 : i32
    %c0_15 = arith.constant 0 : index
    %c0_16 = arith.constant 0 : index
    %17 = vector.load %arg13[%c0_15, %c0_16] : memref<8x64xbf16, #tpu.memory_space<vmem>>, vector<8x64xbf16>
    %18 = vector.extract_strided_slice %17 {offsets = [0, 0], sizes = [8, 32], strides = [1, 1]} : vector<8x64xbf16> to vector<8x32xbf16>
    %19 = arith.extf %18 : vector<8x32xbf16> to vector<8x32xf32>
    %20 = vector.extract_strided_slice %17 {offsets = [0, 32], sizes = [8, 32], strides = [1, 1]} : vector<8x64xbf16> to vector<8x32xbf16>
    %21 = arith.extf %20 : vector<8x32xbf16> to vector<8x32xf32>
    %22 = arith.index_cast %16 : i32 to index
    %c0_17 = arith.constant 0 : index
    %23 = vector.load %arg10[%22, %c0_17] : memref<64x32xf32, #tpu.memory_space<vmem>>, vector<8x32xf32>
    %c0_18 = arith.constant 0 : index
    %c0_19 = arith.constant 0 : index
    %24 = vector.load %arg14[%c0_18, %c0_19] : memref<8x32xf32, #tpu.memory_space<vmem>>, vector<8x32xf32>
    %cst_20 = arith.constant 0.899999976 : f32
    %25 = vector.broadcast %cst_20 : f32 to vector<8x32xf32>
    %26 = arith.mulf %25, %24 : vector<8x32xf32>
    %27 = arith.addf %26, %23 : vector<8x32xf32>
    %cst_21 = arith.constant 1.000000e+00 : f32
    %28 = vector.broadcast %cst_21 : f32 to vector<8x32xf32>
    %29 = arith.mulf %19, %28 : vector<8x32xf32>
    %30 = arith.subf %27, %29 : vector<8x32xf32>
    %c0_22 = arith.constant 0 : index
    %c0_23 = arith.constant 0 : index
    %31 = vector.load %arg14[%c0_22, %c0_23] : memref<8x32xf32, #tpu.memory_space<vmem>>, vector<8x32xf32>
    tpu.vector_store %arg14[%c0_22, %c0_23], %30 {strides = array<i32>} : memref<8x32xf32, #tpu.memory_space<vmem>>, vector<8x32xf32>,
    %cst_24 = arith.constant 1.000000e+00 : f32
    %32 = vector.broadcast %cst_24 : f32 to vector<8x32xf32>
    %33 = arith.cmpf ogt, %30, %32 : vector<8x32xf32>
    %34 = arith.extui %33 : vector<8x32xi1> to vector<8x32xi32>
    %35 = arith.sitofp %34 : vector<8x32xi32> to vector<8x32xf32>
    %36 = arith.truncf %35 : vector<8x32xf32> to vector<8x32xbf16>
    %c0_25 = arith.constant 0 : index
    %c0_26 = arith.constant 0 : index
    %37 = vector.load %arg13[%c0_25, %c0_26] : memref<8x64xbf16, #tpu.memory_space<vmem>>, vector<8x32xbf16>
    tpu.vector_store %arg13[%c0_25, %c0_26], %36 {strides = array<i32>} : memref<8x64xbf16, #tpu.memory_space<vmem>>, vector<8x32xbf16>,
    %c0_27 = arith.constant 0 : index
    %c0_28 = arith.constant 0 : index
    %38 = vector.load %arg13[%c0_27, %c0_28] : memref<8x64xbf16, #tpu.memory_space<vmem>>, vector<8x64xbf16>
    %cst_29 = arith.constant dense<0.000000e+00> : vector<8x64xf32>
    %39 = tpu.matmul %38, %10, %cst_29 {dimension_numbers = #tpu.dot_dimension_numbers<[1], [0], [0], [1], [0, 0, 1, 1], [], []>} : vector<8x64xbf16>, vector<64x64xbf16>, vector<8x64xf32> -> vector<8x64xf32>
    %40 = vector.extract_strided_slice %39 {offsets = [0, 0], sizes = [8, 32], strides = [1, 1]} : vector<8x64xf32> to vector<8x32xf32>
    %41 = arith.addf %40, %14 : vector<8x32xf32>
    %42 = vector.extract_strided_slice %39 {offsets = [0, 32], sizes = [8, 32], strides = [1, 1]} : vector<8x64xf32> to vector<8x32xf32>
    %c0_30 = arith.constant 0 : index
    %c0_31 = arith.constant 0 : index
    %43 = vector.load %arg16[%c0_30, %c0_31] : memref<8x32xf32, #tpu.memory_space<vmem>>, vector<8x32xf32>
    %cst_32 = arith.constant 8.500000e-01 : f32
    %44 = vector.broadcast %cst_32 : f32 to vector<8x32xf32>
    %45 = arith.mulf %44, %43 : vector<8x32xf32>
    %46 = arith.addf %45, %42 : vector<8x32xf32>
    %c0_33 = arith.constant 0 : index
    %c0_34 = arith.constant 0 : index
    %47 = vector.load %arg17[%c0_33, %c0_34] : memref<8x32xf32, #tpu.memory_space<vmem>>, vector<8x32xf32>
    %cst_35 = arith.constant 1.000000e+00 : f32
    %48 = vector.broadcast %cst_35 : f32 to vector<8x32xf32>
    %49 = arith.mulf %47, %48 : vector<8x32xf32>
    %50 = arith.subf %46, %49 : vector<8x32xf32>
    %c0_36 = arith.constant 0 : index
    %c0_37 = arith.constant 0 : index
    %51 = vector.load %arg16[%c0_36, %c0_37] : memref<8x32xf32, #tpu.memory_space<vmem>>, vector<8x32xf32>
    tpu.vector_store %arg16[%c0_36, %c0_37], %50 {strides = array<i32>} : memref<8x32xf32, #tpu.memory_space<vmem>>, vector<8x32xf32>,
    %cst_38 = arith.constant 1.000000e+00 : f32
    %52 = vector.broadcast %cst_38 : f32 to vector<8x32xf32>
    %53 = arith.cmpf ogt, %50, %52 : vector<8x32xf32>
    %54 = arith.extui %53 : vector<8x32xi1> to vector<8x32xi32>
    %55 = arith.sitofp %54 : vector<8x32xi32> to vector<8x32xf32>
    %c0_39 = arith.constant 0 : index
    %c0_40 = arith.constant 0 : index
    %56 = vector.load %arg17[%c0_39, %c0_40] : memref<8x32xf32, #tpu.memory_space<vmem>>, vector<8x32xf32>
    tpu.vector_store %arg17[%c0_39, %c0_40], %55 {strides = array<i32>} : memref<8x32xf32, #tpu.memory_space<vmem>>, vector<8x32xf32>,
    %57 = arith.truncf %55 : vector<8x32xf32> to vector<8x32xbf16>
    %cst_41 = arith.constant dense<0.000000e+00> : vector<8x32xf32>
    %58 = tpu.matmul %57, %11, %cst_41 {dimension_numbers = #tpu.dot_dimension_numbers<[1], [0], [0], [1], [0, 0, 1, 1], [], []>} : vector<8x32xbf16>, vector<32x32xbf16>, vector<8x32xf32> -> vector<8x32xf32>
    %c0_42 = arith.constant 0 : index
    %c0_43 = arith.constant 0 : index
    %59 = vector.load %arg15[%c0_42, %c0_43] : memref<8x32xf32, #tpu.memory_space<vmem>>, vector<8x32xf32>
    %cst_44 = arith.constant 0.899999976 : f32
    %60 = vector.broadcast %cst_44 : f32 to vector<8x32xf32>
    %61 = arith.mulf %60, %59 : vector<8x32xf32>
    %62 = arith.addf %61, %41 : vector<8x32xf32>
    %63 = arith.subf %62, %58 : vector<8x32xf32>
    %cst_45 = arith.constant 1.000000e+00 : f32
    %64 = vector.broadcast %cst_45 : f32 to vector<8x32xf32>
    %65 = arith.mulf %21, %64 : vector<8x32xf32>
    %66 = arith.subf %63, %65 : vector<8x32xf32>
    %c0_46 = arith.constant 0 : index
    %c0_47 = arith.constant 0 : index
    %67 = vector.load %arg15[%c0_46, %c0_47] : memref<8x32xf32, #tpu.memory_space<vmem>>, vector<8x32xf32>
    tpu.vector_store %arg15[%c0_46, %c0_47], %66 {strides = array<i32>} : memref<8x32xf32, #tpu.memory_space<vmem>>, vector<8x32xf32>,
    %cst_48 = arith.constant 1.000000e+00 : f32
    %68 = vector.broadcast %cst_48 : f32 to vector<8x32xf32>
    %69 = arith.cmpf ogt, %66, %68 : vector<8x32xf32>
    %70 = arith.extui %69 : vector<8x32xi1> to vector<8x32xi32>
    %71 = arith.sitofp %70 : vector<8x32xi32> to vector<8x32xf32>
    %72 = arith.index_cast %16 : i32 to index
    %c0_49 = arith.constant 0 : index
    %73 = vector.load %arg12[%72, %c0_49] : memref<64x32xf32, #tpu.memory_space<vmem>>, vector<8x32xf32>
    tpu.vector_store %arg12[%72, %c0_49], %71 {strides = array<i32>} : memref<64x32xf32, #tpu.memory_space<vmem>>, vector<8x32xf32>,
    %74 = arith.truncf %71 : vector<8x32xf32> to vector<8x32xbf16>
    %c0_50 = arith.constant 0 : index
    %c32 = arith.constant 32 : index
    %75 = vector.load %arg13[%c0_50, %c32] : memref<8x64xbf16, #tpu.memory_space<vmem>>, vector<8x32xbf16>
    tpu.vector_store %arg13[%c0_50, %c32], %74 {strides = array<i32>} : memref<8x64xbf16, #tpu.memory_space<vmem>>, vector<8x32xbf16>,
    %c1_i32 = arith.constant 1 : i32
    %c8_i32_51 = arith.constant 8 : i32
    %76 = arith.muli %c1_i32, %c8_i32_51 : i32
    %77 = tpu.assume_multiple %76, 8 : i32
    %c0_52 = arith.constant 0 : index
    %c0_53 = arith.constant 0 : index
    %78 = vector.load %arg13[%c0_52, %c0_53] : memref<8x64xbf16, #tpu.memory_space<vmem>>, vector<8x64xbf16>
    %79 = vector.extract_strided_slice %78 {offsets = [0, 0], sizes = [8, 32], strides = [1, 1]} : vector<8x64xbf16> to vector<8x32xbf16>
    %80 = arith.extf %79 : vector<8x32xbf16> to vector<8x32xf32>
    %81 = vector.extract_strided_slice %78 {offsets = [0, 32], sizes = [8, 32], strides = [1, 1]} : vector<8x64xbf16> to vector<8x32xbf16>
    %82 = arith.extf %81 : vector<8x32xbf16> to vector<8x32xf32>
    %83 = arith.index_cast %77 : i32 to index
    %c0_54 = arith.constant 0 : index
    %84 = vector.load %arg10[%83, %c0_54] : memref<64x32xf32, #tpu.memory_space<vmem>>, vector<8x32xf32>
    %c0_55 = arith.constant 0 : index
    %c0_56 = arith.constant 0 : index
    %85 = vector.load %arg14[%c0_55, %c0_56] : memref<8x32xf32, #tpu.memory_space<vmem>>, vector<8x32xf32>
    %cst_57 = arith.constant 0.899999976 : f32
    %86 = vector.broadcast %cst_57 : f32 to vector<8x32xf32>
    %87 = arith.mulf %86, %85 : vector<8x32xf32>
    %88 = arith.addf %87, %84 : vector<8x32xf32>
    %cst_58 = arith.constant 1.000000e+00 : f32
    %89 = vector.broadcast %cst_58 : f32 to vector<8x32xf32>
    %90 = arith.mulf %80, %89 : vector<8x32xf32>
    %91 = arith.subf %88, %90 : vector<8x32xf32>
    %c0_59 = arith.constant 0 : index
    %c0_60 = arith.constant 0 : index
    %92 = vector.load %arg14[%c0_59, %c0_60] : memref<8x32xf32, #tpu.memory_space<vmem>>, vector<8x32xf32>
    tpu.vector_store %arg14[%c0_59, %c0_60], %91 {strides = array<i32>} : memref<8x32xf32, #tpu.memory_space<vmem>>, vector<8x32xf32>,
    %cst_61 = arith.constant 1.000000e+00 : f32
    %93 = vector.broadcast %cst_61 : f32 to vector<8x32xf32>
    %94 = arith.cmpf ogt, %91, %93 : vector<8x32xf32>
    %95 = arith.extui %94 : vector<8x32xi1> to vector<8x32xi32>
    %96 = arith.sitofp %95 : vector<8x32xi32> to vector<8x32xf32>
    %97 = arith.truncf %96 : vector<8x32xf32> to vector<8x32xbf16>
    %c0_62 = arith.constant 0 : index
    %c0_63 = arith.constant 0 : index
    %98 = vector.load %arg13[%c0_62, %c0_63] : memref<8x64xbf16, #tpu.memory_space<vmem>>, vector<8x32xbf16>
    tpu.vector_store %arg13[%c0_62, %c0_63], %97 {strides = array<i32>} : memref<8x64xbf16, #tpu.memory_space<vmem>>, vector<8x32xbf16>,
    %c0_64 = arith.constant 0 : index
    %c0_65 = arith.constant 0 : index
    %99 = vector.load %arg13[%c0_64, %c0_65] : memref<8x64xbf16, #tpu.memory_space<vmem>>, vector<8x64xbf16>
    %cst_66 = arith.constant dense<0.000000e+00> : vector<8x64xf32>
    %100 = tpu.matmul %99, %10, %cst_66 {dimension_numbers = #tpu.dot_dimension_numbers<[1], [0], [0], [1], [0, 0, 1, 1], [], []>} : vector<8x64xbf16>, vector<64x64xbf16>, vector<8x64xf32> -> vector<8x64xf32>
    %101 = vector.extract_strided_slice %100 {offsets = [0, 0], sizes = [8, 32], strides = [1, 1]} : vector<8x64xf32> to vector<8x32xf32>
    %102 = arith.addf %101, %14 : vector<8x32xf32>
    %103 = vector.extract_strided_slice %100 {offsets = [0, 32], sizes = [8, 32], strides = [1, 1]} : vector<8x64xf32> to vector<8x32xf32>
    %c0_67 = arith.constant 0 : index
    %c0_68 = arith.constant 0 : index
    %104 = vector.load %arg16[%c0_67, %c0_68] : memref<8x32xf32, #tpu.memory_space<vmem>>, vector<8x32xf32>
    %cst_69 = arith.constant 8.500000e-01 : f32
    %105 = vector.broadcast %cst_69 : f32 to vector<8x32xf32>
    %106 = arith.mulf %105, %104 : vector<8x32xf32>
    %107 = arith.addf %106, %103 : vector<8x32xf32>
    %c0_70 = arith.constant 0 : index
    %c0_71 = arith.constant 0 : index
    %108 = vector.load %arg17[%c0_70, %c0_71] : memref<8x32xf32, #tpu.memory_space<vmem>>, vector<8x32xf32>
    %cst_72 = arith.constant 1.000000e+00 : f32
    %109 = vector.broadcast %cst_72 : f32 to vector<8x32xf32>
    %110 = arith.mulf %108, %109 : vector<8x32xf32>
    %111 = arith.subf %107, %110 : vector<8x32xf32>
    %c0_73 = arith.constant 0 : index
    %c0_74 = arith.constant 0 : index
    %112 = vector.load %arg16[%c0_73, %c0_74] : memref<8x32xf32, #tpu.memory_space<vmem>>, vector<8x32xf32>
    tpu.vector_store %arg16[%c0_73, %c0_74], %111 {strides = array<i32>} : memref<8x32xf32, #tpu.memory_space<vmem>>, vector<8x32xf32>,
    %cst_75 = arith.constant 1.000000e+00 : f32
    %113 = vector.broadcast %cst_75 : f32 to vector<8x32xf32>
    %114 = arith.cmpf ogt, %111, %113 : vector<8x32xf32>
    %115 = arith.extui %114 : vector<8x32xi1> to vector<8x32xi32>
    %116 = arith.sitofp %115 : vector<8x32xi32> to vector<8x32xf32>
    %c0_76 = arith.constant 0 : index
    %c0_77 = arith.constant 0 : index
    %117 = vector.load %arg17[%c0_76, %c0_77] : memref<8x32xf32, #tpu.memory_space<vmem>>, vector<8x32xf32>
    tpu.vector_store %arg17[%c0_76, %c0_77], %116 {strides = array<i32>} : memref<8x32xf32, #tpu.memory_space<vmem>>, vector<8x32xf32>,
    %118 = arith.truncf %116 : vector<8x32xf32> to vector<8x32xbf16>
    %cst_78 = arith.constant dense<0.000000e+00> : vector<8x32xf32>
    %119 = tpu.matmul %118, %11, %cst_78 {dimension_numbers = #tpu.dot_dimension_numbers<[1], [0], [0], [1], [0, 0, 1, 1], [], []>} : vector<8x32xbf16>, vector<32x32xbf16>, vector<8x32xf32> -> vector<8x32xf32>
    %c0_79 = arith.constant 0 : index
    %c0_80 = arith.constant 0 : index
    %120 = vector.load %arg15[%c0_79, %c0_80] : memref<8x32xf32, #tpu.memory_space<vmem>>, vector<8x32xf32>
    %cst_81 = arith.constant 0.899999976 : f32
    %121 = vector.broadcast %cst_81 : f32 to vector<8x32xf32>
    %122 = arith.mulf %121, %120 : vector<8x32xf32>
    %123 = arith.addf %122, %102 : vector<8x32xf32>
    %124 = arith.subf %123, %119 : vector<8x32xf32>
    %cst_82 = arith.constant 1.000000e+00 : f32
    %125 = vector.broadcast %cst_82 : f32 to vector<8x32xf32>
    %126 = arith.mulf %82, %125 : vector<8x32xf32>
    %127 = arith.subf %124, %126 : vector<8x32xf32>
    %c0_83 = arith.constant 0 : index
    %c0_84 = arith.constant 0 : index
    %128 = vector.load %arg15[%c0_83, %c0_84] : memref<8x32xf32, #tpu.memory_space<vmem>>, vector<8x32xf32>
    tpu.vector_store %arg15[%c0_83, %c0_84], %127 {strides = array<i32>} : memref<8x32xf32, #tpu.memory_space<vmem>>, vector<8x32xf32>,
    %cst_85 = arith.constant 1.000000e+00 : f32
    %129 = vector.broadcast %cst_85 : f32 to vector<8x32xf32>
    %130 = arith.cmpf ogt, %127, %129 : vector<8x32xf32>
    %131 = arith.extui %130 : vector<8x32xi1> to vector<8x32xi32>
    %132 = arith.sitofp %131 : vector<8x32xi32> to vector<8x32xf32>
    %133 = arith.index_cast %77 : i32 to index
    %c0_86 = arith.constant 0 : index
    %134 = vector.load %arg12[%133, %c0_86] : memref<64x32xf32, #tpu.memory_space<vmem>>, vector<8x32xf32>
    tpu.vector_store %arg12[%133, %c0_86], %132 {strides = array<i32>} : memref<64x32xf32, #tpu.memory_space<vmem>>, vector<8x32xf32>,
    %135 = arith.truncf %132 : vector<8x32xf32> to vector<8x32xbf16>
    %c0_87 = arith.constant 0 : index
    %c32_88 = arith.constant 32 : index
    %136 = vector.load %arg13[%c0_87, %c32_88] : memref<8x64xbf16, #tpu.memory_space<vmem>>, vector<8x32xbf16>
    tpu.vector_store %arg13[%c0_87, %c32_88], %135 {strides = array<i32>} : memref<8x64xbf16, #tpu.memory_space<vmem>>, vector<8x32xbf16>,
    %c2_i32 = arith.constant 2 : i32
    %c8_i32_89 = arith.constant 8 : i32
    %137 = arith.muli %c2_i32, %c8_i32_89 : i32
    %138 = tpu.assume_multiple %137, 8 : i32
    %c0_90 = arith.constant 0 : index
    %c0_91 = arith.constant 0 : index
    %139 = vector.load %arg13[%c0_90, %c0_91] : memref<8x64xbf16, #tpu.memory_space<vmem>>, vector<8x64xbf16>
    %140 = vector.extract_strided_slice %139 {offsets = [0, 0], sizes = [8, 32], strides = [1, 1]} : vector<8x64xbf16> to vector<8x32xbf16>
    %141 = arith.extf %140 : vector<8x32xbf16> to vector<8x32xf32>
    %142 = vector.extract_strided_slice %139 {offsets = [0, 32], sizes = [8, 32], strides = [1, 1]} : vector<8x64xbf16> to vector<8x32xbf16>
    %143 = arith.extf %142 : vector<8x32xbf16> to vector<8x32xf32>
    %144 = arith.index_cast %138 : i32 to index
    %c0_92 = arith.constant 0 : index
    %145 = vector.load %arg10[%144, %c0_92] : memref<64x32xf32, #tpu.memory_space<vmem>>, vector<8x32xf32>
    %c0_93 = arith.constant 0 : index
    %c0_94 = arith.constant 0 : index
    %146 = vector.load %arg14[%c0_93, %c0_94] : memref<8x32xf32, #tpu.memory_space<vmem>>, vector<8x32xf32>
    %cst_95 = arith.constant 0.899999976 : f32
    %147 = vector.broadcast %cst_95 : f32 to vector<8x32xf32>
    %148 = arith.mulf %147, %146 : vector<8x32xf32>
    %149 = arith.addf %148, %145 : vector<8x32xf32>
    %cst_96 = arith.constant 1.000000e+00 : f32
    %150 = vector.broadcast %cst_96 : f32 to vector<8x32xf32>
    %151 = arith.mulf %141, %150 : vector<8x32xf32>
    %152 = arith.subf %149, %151 : vector<8x32xf32>
    %c0_97 = arith.constant 0 : index
    %c0_98 = arith.constant 0 : index
    %153 = vector.load %arg14[%c0_97, %c0_98] : memref<8x32xf32, #tpu.memory_space<vmem>>, vector<8x32xf32>
    tpu.vector_store %arg14[%c0_97, %c0_98], %152 {strides = array<i32>} : memref<8x32xf32, #tpu.memory_space<vmem>>, vector<8x32xf32>,
    %cst_99 = arith.constant 1.000000e+00 : f32
    %154 = vector.broadcast %cst_99 : f32 to vector<8x32xf32>
    %155 = arith.cmpf ogt, %152, %154 : vector<8x32xf32>
    %156 = arith.extui %155 : vector<8x32xi1> to vector<8x32xi32>
    %157 = arith.sitofp %156 : vector<8x32xi32> to vector<8x32xf32>
    %158 = arith.truncf %157 : vector<8x32xf32> to vector<8x32xbf16>
    %c0_100 = arith.constant 0 : index
    %c0_101 = arith.constant 0 : index
    %159 = vector.load %arg13[%c0_100, %c0_101] : memref<8x64xbf16, #tpu.memory_space<vmem>>, vector<8x32xbf16>
    tpu.vector_store %arg13[%c0_100, %c0_101], %158 {strides = array<i32>} : memref<8x64xbf16, #tpu.memory_space<vmem>>, vector<8x32xbf16>,
    %c0_102 = arith.constant 0 : index
    %c0_103 = arith.constant 0 : index
    %160 = vector.load %arg13[%c0_102, %c0_103] : memref<8x64xbf16, #tpu.memory_space<vmem>>, vector<8x64xbf16>
    %cst_104 = arith.constant dense<0.000000e+00> : vector<8x64xf32>
    %161 = tpu.matmul %160, %10, %cst_104 {dimension_numbers = #tpu.dot_dimension_numbers<[1], [0], [0], [1], [0, 0, 1, 1], [], []>} : vector<8x64xbf16>, vector<64x64xbf16>, vector<8x64xf32> -> vector<8x64xf32>
    %162 = vector.extract_strided_slice %161 {offsets = [0, 0], sizes = [8, 32], strides = [1, 1]} : vector<8x64xf32> to vector<8x32xf32>
    %163 = arith.addf %162, %14 : vector<8x32xf32>
    %164 = vector.extract_strided_slice %161 {offsets = [0, 32], sizes = [8, 32], strides = [1, 1]} : vector<8x64xf32> to vector<8x32xf32>
    %c0_105 = arith.constant 0 : index
    %c0_106 = arith.constant 0 : index
    %165 = vector.load %arg16[%c0_105, %c0_106] : memref<8x32xf32, #tpu.memory_space<vmem>>, vector<8x32xf32>
    %cst_107 = arith.constant 8.500000e-01 : f32
    %166 = vector.broadcast %cst_107 : f32 to vector<8x32xf32>
    %167 = arith.mulf %166, %165 : vector<8x32xf32>
    %168 = arith.addf %167, %164 : vector<8x32xf32>
    %c0_108 = arith.constant 0 : index
    %c0_109 = arith.constant 0 : index
    %169 = vector.load %arg17[%c0_108, %c0_109] : memref<8x32xf32, #tpu.memory_space<vmem>>, vector<8x32xf32>
    %cst_110 = arith.constant 1.000000e+00 : f32
    %170 = vector.broadcast %cst_110 : f32 to vector<8x32xf32>
    %171 = arith.mulf %169, %170 : vector<8x32xf32>
    %172 = arith.subf %168, %171 : vector<8x32xf32>
    %c0_111 = arith.constant 0 : index
    %c0_112 = arith.constant 0 : index
    %173 = vector.load %arg16[%c0_111, %c0_112] : memref<8x32xf32, #tpu.memory_space<vmem>>, vector<8x32xf32>
    tpu.vector_store %arg16[%c0_111, %c0_112], %172 {strides = array<i32>} : memref<8x32xf32, #tpu.memory_space<vmem>>, vector<8x32xf32>,
    %cst_113 = arith.constant 1.000000e+00 : f32
    %174 = vector.broadcast %cst_113 : f32 to vector<8x32xf32>
    %175 = arith.cmpf ogt, %172, %174 : vector<8x32xf32>
    %176 = arith.extui %175 : vector<8x32xi1> to vector<8x32xi32>
    %177 = arith.sitofp %176 : vector<8x32xi32> to vector<8x32xf32>
    %c0_114 = arith.constant 0 : index
    %c0_115 = arith.constant 0 : index
    %178 = vector.load %arg17[%c0_114, %c0_115] : memref<8x32xf32, #tpu.memory_space<vmem>>, vector<8x32xf32>
    tpu.vector_store %arg17[%c0_114, %c0_115], %177 {strides = array<i32>} : memref<8x32xf32, #tpu.memory_space<vmem>>, vector<8x32xf32>,
    %179 = arith.truncf %177 : vector<8x32xf32> to vector<8x32xbf16>
    %cst_116 = arith.constant dense<0.000000e+00> : vector<8x32xf32>
    %180 = tpu.matmul %179, %11, %cst_116 {dimension_numbers = #tpu.dot_dimension_numbers<[1], [0], [0], [1], [0, 0, 1, 1], [], []>} : vector<8x32xbf16>, vector<32x32xbf16>, vector<8x32xf32> -> vector<8x32xf32>
    %c0_117 = arith.constant 0 : index
    %c0_118 = arith.constant 0 : index
    %181 = vector.load %arg15[%c0_117, %c0_118] : memref<8x32xf32, #tpu.memory_space<vmem>>, vector<8x32xf32>
    %cst_119 = arith.constant 0.899999976 : f32
    %182 = vector.broadcast %cst_119 : f32 to vector<8x32xf32>
    %183 = arith.mulf %182, %181 : vector<8x32xf32>
    %184 = arith.addf %183, %163 : vector<8x32xf32>
    %185 = arith.subf %184, %180 : vector<8x32xf32>
    %cst_120 = arith.constant 1.000000e+00 : f32
    %186 = vector.broadcast %cst_120 : f32 to vector<8x32xf32>
    %187 = arith.mulf %143, %186 : vector<8x32xf32>
    %188 = arith.subf %185, %187 : vector<8x32xf32>
    %c0_121 = arith.constant 0 : index
    %c0_122 = arith.constant 0 : index
    %189 = vector.load %arg15[%c0_121, %c0_122] : memref<8x32xf32, #tpu.memory_space<vmem>>, vector<8x32xf32>
    tpu.vector_store %arg15[%c0_121, %c0_122], %188 {strides = array<i32>} : memref<8x32xf32, #tpu.memory_space<vmem>>, vector<8x32xf32>,
    %cst_123 = arith.constant 1.000000e+00 : f32
    %190 = vector.broadcast %cst_123 : f32 to vector<8x32xf32>
    %191 = arith.cmpf ogt, %188, %190 : vector<8x32xf32>
    %192 = arith.extui %191 : vector<8x32xi1> to vector<8x32xi32>
    %193 = arith.sitofp %192 : vector<8x32xi32> to vector<8x32xf32>
    %194 = arith.index_cast %138 : i32 to index
    %c0_124 = arith.constant 0 : index
    %195 = vector.load %arg12[%194, %c0_124] : memref<64x32xf32, #tpu.memory_space<vmem>>, vector<8x32xf32>
    tpu.vector_store %arg12[%194, %c0_124], %193 {strides = array<i32>} : memref<64x32xf32, #tpu.memory_space<vmem>>, vector<8x32xf32>,
    %196 = arith.truncf %193 : vector<8x32xf32> to vector<8x32xbf16>
    %c0_125 = arith.constant 0 : index
    %c32_126 = arith.constant 32 : index
    %197 = vector.load %arg13[%c0_125, %c32_126] : memref<8x64xbf16, #tpu.memory_space<vmem>>, vector<8x32xbf16>
    tpu.vector_store %arg13[%c0_125, %c32_126], %196 {strides = array<i32>} : memref<8x64xbf16, #tpu.memory_space<vmem>>, vector<8x32xbf16>,
    %c3_i32 = arith.constant 3 : i32
    %c8_i32_127 = arith.constant 8 : i32
    %198 = arith.muli %c3_i32, %c8_i32_127 : i32
    %199 = tpu.assume_multiple %198, 8 : i32
    %c0_128 = arith.constant 0 : index
    %c0_129 = arith.constant 0 : index
    %200 = vector.load %arg13[%c0_128, %c0_129] : memref<8x64xbf16, #tpu.memory_space<vmem>>, vector<8x64xbf16>
    %201 = vector.extract_strided_slice %200 {offsets = [0, 0], sizes = [8, 32], strides = [1, 1]} : vector<8x64xbf16> to vector<8x32xbf16>
    %202 = arith.extf %201 : vector<8x32xbf16> to vector<8x32xf32>
    %203 = vector.extract_strided_slice %200 {offsets = [0, 32], sizes = [8, 32], strides = [1, 1]} : vector<8x64xbf16> to vector<8x32xbf16>
    %204 = arith.extf %203 : vector<8x32xbf16> to vector<8x32xf32>
    %205 = arith.index_cast %199 : i32 to index
    %c0_130 = arith.constant 0 : index
    %206 = vector.load %arg10[%205, %c0_130] : memref<64x32xf32, #tpu.memory_space<vmem>>, vector<8x32xf32>
    %c0_131 = arith.constant 0 : index
    %c0_132 = arith.constant 0 : index
    %207 = vector.load %arg14[%c0_131, %c0_132] : memref<8x32xf32, #tpu.memory_space<vmem>>, vector<8x32xf32>
    %cst_133 = arith.constant 0.899999976 : f32
    %208 = vector.broadcast %cst_133 : f32 to vector<8x32xf32>
    %209 = arith.mulf %208, %207 : vector<8x32xf32>
    %210 = arith.addf %209, %206 : vector<8x32xf32>
    %cst_134 = arith.constant 1.000000e+00 : f32
    %211 = vector.broadcast %cst_134 : f32 to vector<8x32xf32>
    %212 = arith.mulf %202, %211 : vector<8x32xf32>
    %213 = arith.subf %210, %212 : vector<8x32xf32>
    %c0_135 = arith.constant 0 : index
    %c0_136 = arith.constant 0 : index
    %214 = vector.load %arg14[%c0_135, %c0_136] : memref<8x32xf32, #tpu.memory_space<vmem>>, vector<8x32xf32>
    tpu.vector_store %arg14[%c0_135, %c0_136], %213 {strides = array<i32>} : memref<8x32xf32, #tpu.memory_space<vmem>>, vector<8x32xf32>,
    %cst_137 = arith.constant 1.000000e+00 : f32
    %215 = vector.broadcast %cst_137 : f32 to vector<8x32xf32>
    %216 = arith.cmpf ogt, %213, %215 : vector<8x32xf32>
    %217 = arith.extui %216 : vector<8x32xi1> to vector<8x32xi32>
    %218 = arith.sitofp %217 : vector<8x32xi32> to vector<8x32xf32>
    %219 = arith.truncf %218 : vector<8x32xf32> to vector<8x32xbf16>
    %c0_138 = arith.constant 0 : index
    %c0_139 = arith.constant 0 : index
    %220 = vector.load %arg13[%c0_138, %c0_139] : memref<8x64xbf16, #tpu.memory_space<vmem>>, vector<8x32xbf16>
    tpu.vector_store %arg13[%c0_138, %c0_139], %219 {strides = array<i32>} : memref<8x64xbf16, #tpu.memory_space<vmem>>, vector<8x32xbf16>,
    %c0_140 = arith.constant 0 : index
    %c0_141 = arith.constant 0 : index
    %221 = vector.load %arg13[%c0_140, %c0_141] : memref<8x64xbf16, #tpu.memory_space<vmem>>, vector<8x64xbf16>
    %cst_142 = arith.constant dense<0.000000e+00> : vector<8x64xf32>
    %222 = tpu.matmul %221, %10, %cst_142 {dimension_numbers = #tpu.dot_dimension_numbers<[1], [0], [0], [1], [0, 0, 1, 1], [], []>} : vector<8x64xbf16>, vector<64x64xbf16>, vector<8x64xf32> -> vector<8x64xf32>
    %223 = vector.extract_strided_slice %222 {offsets = [0, 0], sizes = [8, 32], strides = [1, 1]} : vector<8x64xf32> to vector<8x32xf32>
    %224 = arith.addf %223, %14 : vector<8x32xf32>
    %225 = vector.extract_strided_slice %222 {offsets = [0, 32], sizes = [8, 32], strides = [1, 1]} : vector<8x64xf32> to vector<8x32xf32>
    %c0_143 = arith.constant 0 : index
    %c0_144 = arith.constant 0 : index
    %226 = vector.load %arg16[%c0_143, %c0_144] : memref<8x32xf32, #tpu.memory_space<vmem>>, vector<8x32xf32>
    %cst_145 = arith.constant 8.500000e-01 : f32
    %227 = vector.broadcast %cst_145 : f32 to vector<8x32xf32>
    %228 = arith.mulf %227, %226 : vector<8x32xf32>
    %229 = arith.addf %228, %225 : vector<8x32xf32>
    %c0_146 = arith.constant 0 : index
    %c0_147 = arith.constant 0 : index
    %230 = vector.load %arg17[%c0_146, %c0_147] : memref<8x32xf32, #tpu.memory_space<vmem>>, vector<8x32xf32>
    %cst_148 = arith.constant 1.000000e+00 : f32
    %231 = vector.broadcast %cst_148 : f32 to vector<8x32xf32>
    %232 = arith.mulf %230, %231 : vector<8x32xf32>
    %233 = arith.subf %229, %232 : vector<8x32xf32>
    %c0_149 = arith.constant 0 : index
    %c0_150 = arith.constant 0 : index
    %234 = vector.load %arg16[%c0_149, %c0_150] : memref<8x32xf32, #tpu.memory_space<vmem>>, vector<8x32xf32>
    tpu.vector_store %arg16[%c0_149, %c0_150], %233 {strides = array<i32>} : memref<8x32xf32, #tpu.memory_space<vmem>>, vector<8x32xf32>,
    %cst_151 = arith.constant 1.000000e+00 : f32
    %235 = vector.broadcast %cst_151 : f32 to vector<8x32xf32>
    %236 = arith.cmpf ogt, %233, %235 : vector<8x32xf32>
    %237 = arith.extui %236 : vector<8x32xi1> to vector<8x32xi32>
    %238 = arith.sitofp %237 : vector<8x32xi32> to vector<8x32xf32>
    %c0_152 = arith.constant 0 : index
    %c0_153 = arith.constant 0 : index
    %239 = vector.load %arg17[%c0_152, %c0_153] : memref<8x32xf32, #tpu.memory_space<vmem>>, vector<8x32xf32>
    tpu.vector_store %arg17[%c0_152, %c0_153], %238 {strides = array<i32>} : memref<8x32xf32, #tpu.memory_space<vmem>>, vector<8x32xf32>,
    %240 = arith.truncf %238 : vector<8x32xf32> to vector<8x32xbf16>
    %cst_154 = arith.constant dense<0.000000e+00> : vector<8x32xf32>
    %241 = tpu.matmul %240, %11, %cst_154 {dimension_numbers = #tpu.dot_dimension_numbers<[1], [0], [0], [1], [0, 0, 1, 1], [], []>} : vector<8x32xbf16>, vector<32x32xbf16>, vector<8x32xf32> -> vector<8x32xf32>
    %c0_155 = arith.constant 0 : index
    %c0_156 = arith.constant 0 : index
    %242 = vector.load %arg15[%c0_155, %c0_156] : memref<8x32xf32, #tpu.memory_space<vmem>>, vector<8x32xf32>
    %cst_157 = arith.constant 0.899999976 : f32
    %243 = vector.broadcast %cst_157 : f32 to vector<8x32xf32>
    %244 = arith.mulf %243, %242 : vector<8x32xf32>
    %245 = arith.addf %244, %224 : vector<8x32xf32>
    %246 = arith.subf %245, %241 : vector<8x32xf32>
    %cst_158 = arith.constant 1.000000e+00 : f32
    %247 = vector.broadcast %cst_158 : f32 to vector<8x32xf32>
    %248 = arith.mulf %204, %247 : vector<8x32xf32>
    %249 = arith.subf %246, %248 : vector<8x32xf32>
    %c0_159 = arith.constant 0 : index
    %c0_160 = arith.constant 0 : index
    %250 = vector.load %arg15[%c0_159, %c0_160] : memref<8x32xf32, #tpu.memory_space<vmem>>, vector<8x32xf32>
    tpu.vector_store %arg15[%c0_159, %c0_160], %249 {strides = array<i32>} : memref<8x32xf32, #tpu.memory_space<vmem>>, vector<8x32xf32>,
    %cst_161 = arith.constant 1.000000e+00 : f32
    %251 = vector.broadcast %cst_161 : f32 to vector<8x32xf32>
    %252 = arith.cmpf ogt, %249, %251 : vector<8x32xf32>
    %253 = arith.extui %252 : vector<8x32xi1> to vector<8x32xi32>
    %254 = arith.sitofp %253 : vector<8x32xi32> to vector<8x32xf32>
    %255 = arith.index_cast %199 : i32 to index
    %c0_162 = arith.constant 0 : index
    %256 = vector.load %arg12[%255, %c0_162] : memref<64x32xf32, #tpu.memory_space<vmem>>, vector<8x32xf32>
    tpu.vector_store %arg12[%255, %c0_162], %254 {strides = array<i32>} : memref<64x32xf32, #tpu.memory_space<vmem>>, vector<8x32xf32>,
    %257 = arith.truncf %254 : vector<8x32xf32> to vector<8x32xbf16>
    %c0_163 = arith.constant 0 : index
    %c32_164 = arith.constant 32 : index
    %258 = vector.load %arg13[%c0_163, %c32_164] : memref<8x64xbf16, #tpu.memory_space<vmem>>, vector<8x32xbf16>
    tpu.vector_store %arg13[%c0_163, %c32_164], %257 {strides = array<i32>} : memref<8x64xbf16, #tpu.memory_space<vmem>>, vector<8x32xbf16>,
    %c4_i32 = arith.constant 4 : i32
    %c8_i32_165 = arith.constant 8 : i32
    %259 = arith.muli %c4_i32, %c8_i32_165 : i32
    %260 = tpu.assume_multiple %259, 8 : i32
    %c0_166 = arith.constant 0 : index
    %c0_167 = arith.constant 0 : index
    %261 = vector.load %arg13[%c0_166, %c0_167] : memref<8x64xbf16, #tpu.memory_space<vmem>>, vector<8x64xbf16>
    %262 = vector.extract_strided_slice %261 {offsets = [0, 0], sizes = [8, 32], strides = [1, 1]} : vector<8x64xbf16> to vector<8x32xbf16>
    %263 = arith.extf %262 : vector<8x32xbf16> to vector<8x32xf32>
    %264 = vector.extract_strided_slice %261 {offsets = [0, 32], sizes = [8, 32], strides = [1, 1]} : vector<8x64xbf16> to vector<8x32xbf16>
    %265 = arith.extf %264 : vector<8x32xbf16> to vector<8x32xf32>
    %266 = arith.index_cast %260 : i32 to index
    %c0_168 = arith.constant 0 : index
    %267 = vector.load %arg10[%266, %c0_168] : memref<64x32xf32, #tpu.memory_space<vmem>>, vector<8x32xf32>
    %c0_169 = arith.constant 0 : index
    %c0_170 = arith.constant 0 : index
    %268 = vector.load %arg14[%c0_169, %c0_170] : memref<8x32xf32, #tpu.memory_space<vmem>>, vector<8x32xf32>
    %cst_171 = arith.constant 0.899999976 : f32
    %269 = vector.broadcast %cst_171 : f32 to vector<8x32xf32>
    %270 = arith.mulf %269, %268 : vector<8x32xf32>
    %271 = arith.addf %270, %267 : vector<8x32xf32>
    %cst_172 = arith.constant 1.000000e+00 : f32
    %272 = vector.broadcast %cst_172 : f32 to vector<8x32xf32>
    %273 = arith.mulf %263, %272 : vector<8x32xf32>
    %274 = arith.subf %271, %273 : vector<8x32xf32>
    %c0_173 = arith.constant 0 : index
    %c0_174 = arith.constant 0 : index
    %275 = vector.load %arg14[%c0_173, %c0_174] : memref<8x32xf32, #tpu.memory_space<vmem>>, vector<8x32xf32>
    tpu.vector_store %arg14[%c0_173, %c0_174], %274 {strides = array<i32>} : memref<8x32xf32, #tpu.memory_space<vmem>>, vector<8x32xf32>,
    %cst_175 = arith.constant 1.000000e+00 : f32
    %276 = vector.broadcast %cst_175 : f32 to vector<8x32xf32>
    %277 = arith.cmpf ogt, %274, %276 : vector<8x32xf32>
    %278 = arith.extui %277 : vector<8x32xi1> to vector<8x32xi32>
    %279 = arith.sitofp %278 : vector<8x32xi32> to vector<8x32xf32>
    %280 = arith.truncf %279 : vector<8x32xf32> to vector<8x32xbf16>
    %c0_176 = arith.constant 0 : index
    %c0_177 = arith.constant 0 : index
    %281 = vector.load %arg13[%c0_176, %c0_177] : memref<8x64xbf16, #tpu.memory_space<vmem>>, vector<8x32xbf16>
    tpu.vector_store %arg13[%c0_176, %c0_177], %280 {strides = array<i32>} : memref<8x64xbf16, #tpu.memory_space<vmem>>, vector<8x32xbf16>,
    %c0_178 = arith.constant 0 : index
    %c0_179 = arith.constant 0 : index
    %282 = vector.load %arg13[%c0_178, %c0_179] : memref<8x64xbf16, #tpu.memory_space<vmem>>, vector<8x64xbf16>
    %cst_180 = arith.constant dense<0.000000e+00> : vector<8x64xf32>
    %283 = tpu.matmul %282, %10, %cst_180 {dimension_numbers = #tpu.dot_dimension_numbers<[1], [0], [0], [1], [0, 0, 1, 1], [], []>} : vector<8x64xbf16>, vector<64x64xbf16>, vector<8x64xf32> -> vector<8x64xf32>
    %284 = vector.extract_strided_slice %283 {offsets = [0, 0], sizes = [8, 32], strides = [1, 1]} : vector<8x64xf32> to vector<8x32xf32>
    %285 = arith.addf %284, %14 : vector<8x32xf32>
    %286 = vector.extract_strided_slice %283 {offsets = [0, 32], sizes = [8, 32], strides = [1, 1]} : vector<8x64xf32> to vector<8x32xf32>
    %c0_181 = arith.constant 0 : index
    %c0_182 = arith.constant 0 : index
    %287 = vector.load %arg16[%c0_181, %c0_182] : memref<8x32xf32, #tpu.memory_space<vmem>>, vector<8x32xf32>
    %cst_183 = arith.constant 8.500000e-01 : f32
    %288 = vector.broadcast %cst_183 : f32 to vector<8x32xf32>
    %289 = arith.mulf %288, %287 : vector<8x32xf32>
    %290 = arith.addf %289, %286 : vector<8x32xf32>
    %c0_184 = arith.constant 0 : index
    %c0_185 = arith.constant 0 : index
    %291 = vector.load %arg17[%c0_184, %c0_185] : memref<8x32xf32, #tpu.memory_space<vmem>>, vector<8x32xf32>
    %cst_186 = arith.constant 1.000000e+00 : f32
    %292 = vector.broadcast %cst_186 : f32 to vector<8x32xf32>
    %293 = arith.mulf %291, %292 : vector<8x32xf32>
    %294 = arith.subf %290, %293 : vector<8x32xf32>
    %c0_187 = arith.constant 0 : index
    %c0_188 = arith.constant 0 : index
    %295 = vector.load %arg16[%c0_187, %c0_188] : memref<8x32xf32, #tpu.memory_space<vmem>>, vector<8x32xf32>
    tpu.vector_store %arg16[%c0_187, %c0_188], %294 {strides = array<i32>} : memref<8x32xf32, #tpu.memory_space<vmem>>, vector<8x32xf32>,
    %cst_189 = arith.constant 1.000000e+00 : f32
    %296 = vector.broadcast %cst_189 : f32 to vector<8x32xf32>
    %297 = arith.cmpf ogt, %294, %296 : vector<8x32xf32>
    %298 = arith.extui %297 : vector<8x32xi1> to vector<8x32xi32>
    %299 = arith.sitofp %298 : vector<8x32xi32> to vector<8x32xf32>
    %c0_190 = arith.constant 0 : index
    %c0_191 = arith.constant 0 : index
    %300 = vector.load %arg17[%c0_190, %c0_191] : memref<8x32xf32, #tpu.memory_space<vmem>>, vector<8x32xf32>
    tpu.vector_store %arg17[%c0_190, %c0_191], %299 {strides = array<i32>} : memref<8x32xf32, #tpu.memory_space<vmem>>, vector<8x32xf32>,
    %301 = arith.truncf %299 : vector<8x32xf32> to vector<8x32xbf16>
    %cst_192 = arith.constant dense<0.000000e+00> : vector<8x32xf32>
    %302 = tpu.matmul %301, %11, %cst_192 {dimension_numbers = #tpu.dot_dimension_numbers<[1], [0], [0], [1], [0, 0, 1, 1], [], []>} : vector<8x32xbf16>, vector<32x32xbf16>, vector<8x32xf32> -> vector<8x32xf32>
    %c0_193 = arith.constant 0 : index
    %c0_194 = arith.constant 0 : index
    %303 = vector.load %arg15[%c0_193, %c0_194] : memref<8x32xf32, #tpu.memory_space<vmem>>, vector<8x32xf32>
    %cst_195 = arith.constant 0.899999976 : f32
    %304 = vector.broadcast %cst_195 : f32 to vector<8x32xf32>
    %305 = arith.mulf %304, %303 : vector<8x32xf32>
    %306 = arith.addf %305, %285 : vector<8x32xf32>
    %307 = arith.subf %306, %302 : vector<8x32xf32>
    %cst_196 = arith.constant 1.000000e+00 : f32
    %308 = vector.broadcast %cst_196 : f32 to vector<8x32xf32>
    %309 = arith.mulf %265, %308 : vector<8x32xf32>
    %310 = arith.subf %307, %309 : vector<8x32xf32>
    %c0_197 = arith.constant 0 : index
    %c0_198 = arith.constant 0 : index
    %311 = vector.load %arg15[%c0_197, %c0_198] : memref<8x32xf32, #tpu.memory_space<vmem>>, vector<8x32xf32>
    tpu.vector_store %arg15[%c0_197, %c0_198], %310 {strides = array<i32>} : memref<8x32xf32, #tpu.memory_space<vmem>>, vector<8x32xf32>,
    %cst_199 = arith.constant 1.000000e+00 : f32
    %312 = vector.broadcast %cst_199 : f32 to vector<8x32xf32>
    %313 = arith.cmpf ogt, %310, %312 : vector<8x32xf32>
    %314 = arith.extui %313 : vector<8x32xi1> to vector<8x32xi32>
    %315 = arith.sitofp %314 : vector<8x32xi32> to vector<8x32xf32>
    %316 = arith.index_cast %260 : i32 to index
    %c0_200 = arith.constant 0 : index
    %317 = vector.load %arg12[%316, %c0_200] : memref<64x32xf32, #tpu.memory_space<vmem>>, vector<8x32xf32>
    tpu.vector_store %arg12[%316, %c0_200], %315 {strides = array<i32>} : memref<64x32xf32, #tpu.memory_space<vmem>>, vector<8x32xf32>,
    %318 = arith.truncf %315 : vector<8x32xf32> to vector<8x32xbf16>
    %c0_201 = arith.constant 0 : index
    %c32_202 = arith.constant 32 : index
    %319 = vector.load %arg13[%c0_201, %c32_202] : memref<8x64xbf16, #tpu.memory_space<vmem>>, vector<8x32xbf16>
    tpu.vector_store %arg13[%c0_201, %c32_202], %318 {strides = array<i32>} : memref<8x64xbf16, #tpu.memory_space<vmem>>, vector<8x32xbf16>,
    %c5_i32 = arith.constant 5 : i32
    %c8_i32_203 = arith.constant 8 : i32
    %320 = arith.muli %c5_i32, %c8_i32_203 : i32
    %321 = tpu.assume_multiple %320, 8 : i32
    %c0_204 = arith.constant 0 : index
    %c0_205 = arith.constant 0 : index
    %322 = vector.load %arg13[%c0_204, %c0_205] : memref<8x64xbf16, #tpu.memory_space<vmem>>, vector<8x64xbf16>
    %323 = vector.extract_strided_slice %322 {offsets = [0, 0], sizes = [8, 32], strides = [1, 1]} : vector<8x64xbf16> to vector<8x32xbf16>
    %324 = arith.extf %323 : vector<8x32xbf16> to vector<8x32xf32>
    %325 = vector.extract_strided_slice %322 {offsets = [0, 32], sizes = [8, 32], strides = [1, 1]} : vector<8x64xbf16> to vector<8x32xbf16>
    %326 = arith.extf %325 : vector<8x32xbf16> to vector<8x32xf32>
    %327 = arith.index_cast %321 : i32 to index
    %c0_206 = arith.constant 0 : index
    %328 = vector.load %arg10[%327, %c0_206] : memref<64x32xf32, #tpu.memory_space<vmem>>, vector<8x32xf32>
    %c0_207 = arith.constant 0 : index
    %c0_208 = arith.constant 0 : index
    %329 = vector.load %arg14[%c0_207, %c0_208] : memref<8x32xf32, #tpu.memory_space<vmem>>, vector<8x32xf32>
    %cst_209 = arith.constant 0.899999976 : f32
    %330 = vector.broadcast %cst_209 : f32 to vector<8x32xf32>
    %331 = arith.mulf %330, %329 : vector<8x32xf32>
    %332 = arith.addf %331, %328 : vector<8x32xf32>
    %cst_210 = arith.constant 1.000000e+00 : f32
    %333 = vector.broadcast %cst_210 : f32 to vector<8x32xf32>
    %334 = arith.mulf %324, %333 : vector<8x32xf32>
    %335 = arith.subf %332, %334 : vector<8x32xf32>
    %c0_211 = arith.constant 0 : index
    %c0_212 = arith.constant 0 : index
    %336 = vector.load %arg14[%c0_211, %c0_212] : memref<8x32xf32, #tpu.memory_space<vmem>>, vector<8x32xf32>
    tpu.vector_store %arg14[%c0_211, %c0_212], %335 {strides = array<i32>} : memref<8x32xf32, #tpu.memory_space<vmem>>, vector<8x32xf32>,
    %cst_213 = arith.constant 1.000000e+00 : f32
    %337 = vector.broadcast %cst_213 : f32 to vector<8x32xf32>
    %338 = arith.cmpf ogt, %335, %337 : vector<8x32xf32>
    %339 = arith.extui %338 : vector<8x32xi1> to vector<8x32xi32>
    %340 = arith.sitofp %339 : vector<8x32xi32> to vector<8x32xf32>
    %341 = arith.truncf %340 : vector<8x32xf32> to vector<8x32xbf16>
    %c0_214 = arith.constant 0 : index
    %c0_215 = arith.constant 0 : index
    %342 = vector.load %arg13[%c0_214, %c0_215] : memref<8x64xbf16, #tpu.memory_space<vmem>>, vector<8x32xbf16>
    tpu.vector_store %arg13[%c0_214, %c0_215], %341 {strides = array<i32>} : memref<8x64xbf16, #tpu.memory_space<vmem>>, vector<8x32xbf16>,
    %c0_216 = arith.constant 0 : index
    %c0_217 = arith.constant 0 : index
    %343 = vector.load %arg13[%c0_216, %c0_217] : memref<8x64xbf16, #tpu.memory_space<vmem>>, vector<8x64xbf16>
    %cst_218 = arith.constant dense<0.000000e+00> : vector<8x64xf32>
    %344 = tpu.matmul %343, %10, %cst_218 {dimension_numbers = #tpu.dot_dimension_numbers<[1], [0], [0], [1], [0, 0, 1, 1], [], []>} : vector<8x64xbf16>, vector<64x64xbf16>, vector<8x64xf32> -> vector<8x64xf32>
    %345 = vector.extract_strided_slice %344 {offsets = [0, 0], sizes = [8, 32], strides = [1, 1]} : vector<8x64xf32> to vector<8x32xf32>
    %346 = arith.addf %345, %14 : vector<8x32xf32>
    %347 = vector.extract_strided_slice %344 {offsets = [0, 32], sizes = [8, 32], strides = [1, 1]} : vector<8x64xf32> to vector<8x32xf32>
    %c0_219 = arith.constant 0 : index
    %c0_220 = arith.constant 0 : index
    %348 = vector.load %arg16[%c0_219, %c0_220] : memref<8x32xf32, #tpu.memory_space<vmem>>, vector<8x32xf32>
    %cst_221 = arith.constant 8.500000e-01 : f32
    %349 = vector.broadcast %cst_221 : f32 to vector<8x32xf32>
    %350 = arith.mulf %349, %348 : vector<8x32xf32>
    %351 = arith.addf %350, %347 : vector<8x32xf32>
    %c0_222 = arith.constant 0 : index
    %c0_223 = arith.constant 0 : index
    %352 = vector.load %arg17[%c0_222, %c0_223] : memref<8x32xf32, #tpu.memory_space<vmem>>, vector<8x32xf32>
    %cst_224 = arith.constant 1.000000e+00 : f32
    %353 = vector.broadcast %cst_224 : f32 to vector<8x32xf32>
    %354 = arith.mulf %352, %353 : vector<8x32xf32>
    %355 = arith.subf %351, %354 : vector<8x32xf32>
    %c0_225 = arith.constant 0 : index
    %c0_226 = arith.constant 0 : index
    %356 = vector.load %arg16[%c0_225, %c0_226] : memref<8x32xf32, #tpu.memory_space<vmem>>, vector<8x32xf32>
    tpu.vector_store %arg16[%c0_225, %c0_226], %355 {strides = array<i32>} : memref<8x32xf32, #tpu.memory_space<vmem>>, vector<8x32xf32>,
    %cst_227 = arith.constant 1.000000e+00 : f32
    %357 = vector.broadcast %cst_227 : f32 to vector<8x32xf32>
    %358 = arith.cmpf ogt, %355, %357 : vector<8x32xf32>
    %359 = arith.extui %358 : vector<8x32xi1> to vector<8x32xi32>
    %360 = arith.sitofp %359 : vector<8x32xi32> to vector<8x32xf32>
    %c0_228 = arith.constant 0 : index
    %c0_229 = arith.constant 0 : index
    %361 = vector.load %arg17[%c0_228, %c0_229] : memref<8x32xf32, #tpu.memory_space<vmem>>, vector<8x32xf32>
    tpu.vector_store %arg17[%c0_228, %c0_229], %360 {strides = array<i32>} : memref<8x32xf32, #tpu.memory_space<vmem>>, vector<8x32xf32>,
    %362 = arith.truncf %360 : vector<8x32xf32> to vector<8x32xbf16>
    %cst_230 = arith.constant dense<0.000000e+00> : vector<8x32xf32>
    %363 = tpu.matmul %362, %11, %cst_230 {dimension_numbers = #tpu.dot_dimension_numbers<[1], [0], [0], [1], [0, 0, 1, 1], [], []>} : vector<8x32xbf16>, vector<32x32xbf16>, vector<8x32xf32> -> vector<8x32xf32>
    %c0_231 = arith.constant 0 : index
    %c0_232 = arith.constant 0 : index
    %364 = vector.load %arg15[%c0_231, %c0_232] : memref<8x32xf32, #tpu.memory_space<vmem>>, vector<8x32xf32>
    %cst_233 = arith.constant 0.899999976 : f32
    %365 = vector.broadcast %cst_233 : f32 to vector<8x32xf32>
    %366 = arith.mulf %365, %364 : vector<8x32xf32>
    %367 = arith.addf %366, %346 : vector<8x32xf32>
    %368 = arith.subf %367, %363 : vector<8x32xf32>
    %cst_234 = arith.constant 1.000000e+00 : f32
    %369 = vector.broadcast %cst_234 : f32 to vector<8x32xf32>
    %370 = arith.mulf %326, %369 : vector<8x32xf32>
    %371 = arith.subf %368, %370 : vector<8x32xf32>
    %c0_235 = arith.constant 0 : index
    %c0_236 = arith.constant 0 : index
    %372 = vector.load %arg15[%c0_235, %c0_236] : memref<8x32xf32, #tpu.memory_space<vmem>>, vector<8x32xf32>
    tpu.vector_store %arg15[%c0_235, %c0_236], %371 {strides = array<i32>} : memref<8x32xf32, #tpu.memory_space<vmem>>, vector<8x32xf32>,
    %cst_237 = arith.constant 1.000000e+00 : f32
    %373 = vector.broadcast %cst_237 : f32 to vector<8x32xf32>
    %374 = arith.cmpf ogt, %371, %373 : vector<8x32xf32>
    %375 = arith.extui %374 : vector<8x32xi1> to vector<8x32xi32>
    %376 = arith.sitofp %375 : vector<8x32xi32> to vector<8x32xf32>
    %377 = arith.index_cast %321 : i32 to index
    %c0_238 = arith.constant 0 : index
    %378 = vector.load %arg12[%377, %c0_238] : memref<64x32xf32, #tpu.memory_space<vmem>>, vector<8x32xf32>
    tpu.vector_store %arg12[%377, %c0_238], %376 {strides = array<i32>} : memref<64x32xf32, #tpu.memory_space<vmem>>, vector<8x32xf32>,
    %379 = arith.truncf %376 : vector<8x32xf32> to vector<8x32xbf16>
    %c0_239 = arith.constant 0 : index
    %c32_240 = arith.constant 32 : index
    %380 = vector.load %arg13[%c0_239, %c32_240] : memref<8x64xbf16, #tpu.memory_space<vmem>>, vector<8x32xbf16>
    tpu.vector_store %arg13[%c0_239, %c32_240], %379 {strides = array<i32>} : memref<8x64xbf16, #tpu.memory_space<vmem>>, vector<8x32xbf16>,
    %c6_i32 = arith.constant 6 : i32
    %c8_i32_241 = arith.constant 8 : i32
    %381 = arith.muli %c6_i32, %c8_i32_241 : i32
    %382 = tpu.assume_multiple %381, 8 : i32
    %c0_242 = arith.constant 0 : index
    %c0_243 = arith.constant 0 : index
    %383 = vector.load %arg13[%c0_242, %c0_243] : memref<8x64xbf16, #tpu.memory_space<vmem>>, vector<8x64xbf16>
    %384 = vector.extract_strided_slice %383 {offsets = [0, 0], sizes = [8, 32], strides = [1, 1]} : vector<8x64xbf16> to vector<8x32xbf16>
    %385 = arith.extf %384 : vector<8x32xbf16> to vector<8x32xf32>
    %386 = vector.extract_strided_slice %383 {offsets = [0, 32], sizes = [8, 32], strides = [1, 1]} : vector<8x64xbf16> to vector<8x32xbf16>
    %387 = arith.extf %386 : vector<8x32xbf16> to vector<8x32xf32>
    %388 = arith.index_cast %382 : i32 to index
    %c0_244 = arith.constant 0 : index
    %389 = vector.load %arg10[%388, %c0_244] : memref<64x32xf32, #tpu.memory_space<vmem>>, vector<8x32xf32>
    %c0_245 = arith.constant 0 : index
    %c0_246 = arith.constant 0 : index
    %390 = vector.load %arg14[%c0_245, %c0_246] : memref<8x32xf32, #tpu.memory_space<vmem>>, vector<8x32xf32>
    %cst_247 = arith.constant 0.899999976 : f32
    %391 = vector.broadcast %cst_247 : f32 to vector<8x32xf32>
    %392 = arith.mulf %391, %390 : vector<8x32xf32>
    %393 = arith.addf %392, %389 : vector<8x32xf32>
    %cst_248 = arith.constant 1.000000e+00 : f32
    %394 = vector.broadcast %cst_248 : f32 to vector<8x32xf32>
    %395 = arith.mulf %385, %394 : vector<8x32xf32>
    %396 = arith.subf %393, %395 : vector<8x32xf32>
    %c0_249 = arith.constant 0 : index
    %c0_250 = arith.constant 0 : index
    %397 = vector.load %arg14[%c0_249, %c0_250] : memref<8x32xf32, #tpu.memory_space<vmem>>, vector<8x32xf32>
    tpu.vector_store %arg14[%c0_249, %c0_250], %396 {strides = array<i32>} : memref<8x32xf32, #tpu.memory_space<vmem>>, vector<8x32xf32>,
    %cst_251 = arith.constant 1.000000e+00 : f32
    %398 = vector.broadcast %cst_251 : f32 to vector<8x32xf32>
    %399 = arith.cmpf ogt, %396, %398 : vector<8x32xf32>
    %400 = arith.extui %399 : vector<8x32xi1> to vector<8x32xi32>
    %401 = arith.sitofp %400 : vector<8x32xi32> to vector<8x32xf32>
    %402 = arith.truncf %401 : vector<8x32xf32> to vector<8x32xbf16>
    %c0_252 = arith.constant 0 : index
    %c0_253 = arith.constant 0 : index
    %403 = vector.load %arg13[%c0_252, %c0_253] : memref<8x64xbf16, #tpu.memory_space<vmem>>, vector<8x32xbf16>
    tpu.vector_store %arg13[%c0_252, %c0_253], %402 {strides = array<i32>} : memref<8x64xbf16, #tpu.memory_space<vmem>>, vector<8x32xbf16>,
    %c0_254 = arith.constant 0 : index
    %c0_255 = arith.constant 0 : index
    %404 = vector.load %arg13[%c0_254, %c0_255] : memref<8x64xbf16, #tpu.memory_space<vmem>>, vector<8x64xbf16>
    %cst_256 = arith.constant dense<0.000000e+00> : vector<8x64xf32>
    %405 = tpu.matmul %404, %10, %cst_256 {dimension_numbers = #tpu.dot_dimension_numbers<[1], [0], [0], [1], [0, 0, 1, 1], [], []>} : vector<8x64xbf16>, vector<64x64xbf16>, vector<8x64xf32> -> vector<8x64xf32>
    %406 = vector.extract_strided_slice %405 {offsets = [0, 0], sizes = [8, 32], strides = [1, 1]} : vector<8x64xf32> to vector<8x32xf32>
    %407 = arith.addf %406, %14 : vector<8x32xf32>
    %408 = vector.extract_strided_slice %405 {offsets = [0, 32], sizes = [8, 32], strides = [1, 1]} : vector<8x64xf32> to vector<8x32xf32>
    %c0_257 = arith.constant 0 : index
    %c0_258 = arith.constant 0 : index
    %409 = vector.load %arg16[%c0_257, %c0_258] : memref<8x32xf32, #tpu.memory_space<vmem>>, vector<8x32xf32>
    %cst_259 = arith.constant 8.500000e-01 : f32
    %410 = vector.broadcast %cst_259 : f32 to vector<8x32xf32>
    %411 = arith.mulf %410, %409 : vector<8x32xf32>
    %412 = arith.addf %411, %408 : vector<8x32xf32>
    %c0_260 = arith.constant 0 : index
    %c0_261 = arith.constant 0 : index
    %413 = vector.load %arg17[%c0_260, %c0_261] : memref<8x32xf32, #tpu.memory_space<vmem>>, vector<8x32xf32>
    %cst_262 = arith.constant 1.000000e+00 : f32
    %414 = vector.broadcast %cst_262 : f32 to vector<8x32xf32>
    %415 = arith.mulf %413, %414 : vector<8x32xf32>
    %416 = arith.subf %412, %415 : vector<8x32xf32>
    %c0_263 = arith.constant 0 : index
    %c0_264 = arith.constant 0 : index
    %417 = vector.load %arg16[%c0_263, %c0_264] : memref<8x32xf32, #tpu.memory_space<vmem>>, vector<8x32xf32>
    tpu.vector_store %arg16[%c0_263, %c0_264], %416 {strides = array<i32>} : memref<8x32xf32, #tpu.memory_space<vmem>>, vector<8x32xf32>,
    %cst_265 = arith.constant 1.000000e+00 : f32
    %418 = vector.broadcast %cst_265 : f32 to vector<8x32xf32>
    %419 = arith.cmpf ogt, %416, %418 : vector<8x32xf32>
    %420 = arith.extui %419 : vector<8x32xi1> to vector<8x32xi32>
    %421 = arith.sitofp %420 : vector<8x32xi32> to vector<8x32xf32>
    %c0_266 = arith.constant 0 : index
    %c0_267 = arith.constant 0 : index
    %422 = vector.load %arg17[%c0_266, %c0_267] : memref<8x32xf32, #tpu.memory_space<vmem>>, vector<8x32xf32>
    tpu.vector_store %arg17[%c0_266, %c0_267], %421 {strides = array<i32>} : memref<8x32xf32, #tpu.memory_space<vmem>>, vector<8x32xf32>,
    %423 = arith.truncf %421 : vector<8x32xf32> to vector<8x32xbf16>
    %cst_268 = arith.constant dense<0.000000e+00> : vector<8x32xf32>
    %424 = tpu.matmul %423, %11, %cst_268 {dimension_numbers = #tpu.dot_dimension_numbers<[1], [0], [0], [1], [0, 0, 1, 1], [], []>} : vector<8x32xbf16>, vector<32x32xbf16>, vector<8x32xf32> -> vector<8x32xf32>
    %c0_269 = arith.constant 0 : index
    %c0_270 = arith.constant 0 : index
    %425 = vector.load %arg15[%c0_269, %c0_270] : memref<8x32xf32, #tpu.memory_space<vmem>>, vector<8x32xf32>
    %cst_271 = arith.constant 0.899999976 : f32
    %426 = vector.broadcast %cst_271 : f32 to vector<8x32xf32>
    %427 = arith.mulf %426, %425 : vector<8x32xf32>
    %428 = arith.addf %427, %407 : vector<8x32xf32>
    %429 = arith.subf %428, %424 : vector<8x32xf32>
    %cst_272 = arith.constant 1.000000e+00 : f32
    %430 = vector.broadcast %cst_272 : f32 to vector<8x32xf32>
    %431 = arith.mulf %387, %430 : vector<8x32xf32>
    %432 = arith.subf %429, %431 : vector<8x32xf32>
    %c0_273 = arith.constant 0 : index
    %c0_274 = arith.constant 0 : index
    %433 = vector.load %arg15[%c0_273, %c0_274] : memref<8x32xf32, #tpu.memory_space<vmem>>, vector<8x32xf32>
    tpu.vector_store %arg15[%c0_273, %c0_274], %432 {strides = array<i32>} : memref<8x32xf32, #tpu.memory_space<vmem>>, vector<8x32xf32>,
    %cst_275 = arith.constant 1.000000e+00 : f32
    %434 = vector.broadcast %cst_275 : f32 to vector<8x32xf32>
    %435 = arith.cmpf ogt, %432, %434 : vector<8x32xf32>
    %436 = arith.extui %435 : vector<8x32xi1> to vector<8x32xi32>
    %437 = arith.sitofp %436 : vector<8x32xi32> to vector<8x32xf32>
    %438 = arith.index_cast %382 : i32 to index
    %c0_276 = arith.constant 0 : index
    %439 = vector.load %arg12[%438, %c0_276] : memref<64x32xf32, #tpu.memory_space<vmem>>, vector<8x32xf32>
    tpu.vector_store %arg12[%438, %c0_276], %437 {strides = array<i32>} : memref<64x32xf32, #tpu.memory_space<vmem>>, vector<8x32xf32>,
    %440 = arith.truncf %437 : vector<8x32xf32> to vector<8x32xbf16>
    %c0_277 = arith.constant 0 : index
    %c32_278 = arith.constant 32 : index
    %441 = vector.load %arg13[%c0_277, %c32_278] : memref<8x64xbf16, #tpu.memory_space<vmem>>, vector<8x32xbf16>
    tpu.vector_store %arg13[%c0_277, %c32_278], %440 {strides = array<i32>} : memref<8x64xbf16, #tpu.memory_space<vmem>>, vector<8x32xbf16>,
    %c7_i32 = arith.constant 7 : i32
    %c8_i32_279 = arith.constant 8 : i32
    %442 = arith.muli %c7_i32, %c8_i32_279 : i32
    %443 = tpu.assume_multiple %442, 8 : i32
    %c0_280 = arith.constant 0 : index
    %c0_281 = arith.constant 0 : index
    %444 = vector.load %arg13[%c0_280, %c0_281] : memref<8x64xbf16, #tpu.memory_space<vmem>>, vector<8x64xbf16>
    %445 = vector.extract_strided_slice %444 {offsets = [0, 0], sizes = [8, 32], strides = [1, 1]} : vector<8x64xbf16> to vector<8x32xbf16>
    %446 = arith.extf %445 : vector<8x32xbf16> to vector<8x32xf32>
    %447 = vector.extract_strided_slice %444 {offsets = [0, 32], sizes = [8, 32], strides = [1, 1]} : vector<8x64xbf16> to vector<8x32xbf16>
    %448 = arith.extf %447 : vector<8x32xbf16> to vector<8x32xf32>
    %449 = arith.index_cast %443 : i32 to index
    %c0_282 = arith.constant 0 : index
    %450 = vector.load %arg10[%449, %c0_282] : memref<64x32xf32, #tpu.memory_space<vmem>>, vector<8x32xf32>
    %c0_283 = arith.constant 0 : index
    %c0_284 = arith.constant 0 : index
    %451 = vector.load %arg14[%c0_283, %c0_284] : memref<8x32xf32, #tpu.memory_space<vmem>>, vector<8x32xf32>
    %cst_285 = arith.constant 0.899999976 : f32
    %452 = vector.broadcast %cst_285 : f32 to vector<8x32xf32>
    %453 = arith.mulf %452, %451 : vector<8x32xf32>
    %454 = arith.addf %453, %450 : vector<8x32xf32>
    %cst_286 = arith.constant 1.000000e+00 : f32
    %455 = vector.broadcast %cst_286 : f32 to vector<8x32xf32>
    %456 = arith.mulf %446, %455 : vector<8x32xf32>
    %457 = arith.subf %454, %456 : vector<8x32xf32>
    %c0_287 = arith.constant 0 : index
    %c0_288 = arith.constant 0 : index
    %458 = vector.load %arg14[%c0_287, %c0_288] : memref<8x32xf32, #tpu.memory_space<vmem>>, vector<8x32xf32>
    tpu.vector_store %arg14[%c0_287, %c0_288], %457 {strides = array<i32>} : memref<8x32xf32, #tpu.memory_space<vmem>>, vector<8x32xf32>,
    %cst_289 = arith.constant 1.000000e+00 : f32
    %459 = vector.broadcast %cst_289 : f32 to vector<8x32xf32>
    %460 = arith.cmpf ogt, %457, %459 : vector<8x32xf32>
    %461 = arith.extui %460 : vector<8x32xi1> to vector<8x32xi32>
    %462 = arith.sitofp %461 : vector<8x32xi32> to vector<8x32xf32>
    %463 = arith.truncf %462 : vector<8x32xf32> to vector<8x32xbf16>
    %c0_290 = arith.constant 0 : index
    %c0_291 = arith.constant 0 : index
    %464 = vector.load %arg13[%c0_290, %c0_291] : memref<8x64xbf16, #tpu.memory_space<vmem>>, vector<8x32xbf16>
    tpu.vector_store %arg13[%c0_290, %c0_291], %463 {strides = array<i32>} : memref<8x64xbf16, #tpu.memory_space<vmem>>, vector<8x32xbf16>,
    %c0_292 = arith.constant 0 : index
    %c0_293 = arith.constant 0 : index
    %465 = vector.load %arg13[%c0_292, %c0_293] : memref<8x64xbf16, #tpu.memory_space<vmem>>, vector<8x64xbf16>
    %cst_294 = arith.constant dense<0.000000e+00> : vector<8x64xf32>
    %466 = tpu.matmul %465, %10, %cst_294 {dimension_numbers = #tpu.dot_dimension_numbers<[1], [0], [0], [1], [0, 0, 1, 1], [], []>} : vector<8x64xbf16>, vector<64x64xbf16>, vector<8x64xf32> -> vector<8x64xf32>
    %467 = vector.extract_strided_slice %466 {offsets = [0, 0], sizes = [8, 32], strides = [1, 1]} : vector<8x64xf32> to vector<8x32xf32>
    %468 = arith.addf %467, %14 : vector<8x32xf32>
    %469 = vector.extract_strided_slice %466 {offsets = [0, 32], sizes = [8, 32], strides = [1, 1]} : vector<8x64xf32> to vector<8x32xf32>
    %c0_295 = arith.constant 0 : index
    %c0_296 = arith.constant 0 : index
    %470 = vector.load %arg16[%c0_295, %c0_296] : memref<8x32xf32, #tpu.memory_space<vmem>>, vector<8x32xf32>
    %cst_297 = arith.constant 8.500000e-01 : f32
    %471 = vector.broadcast %cst_297 : f32 to vector<8x32xf32>
    %472 = arith.mulf %471, %470 : vector<8x32xf32>
    %473 = arith.addf %472, %469 : vector<8x32xf32>
    %c0_298 = arith.constant 0 : index
    %c0_299 = arith.constant 0 : index
    %474 = vector.load %arg17[%c0_298, %c0_299] : memref<8x32xf32, #tpu.memory_space<vmem>>, vector<8x32xf32>
    %cst_300 = arith.constant 1.000000e+00 : f32
    %475 = vector.broadcast %cst_300 : f32 to vector<8x32xf32>
    %476 = arith.mulf %474, %475 : vector<8x32xf32>
    %477 = arith.subf %473, %476 : vector<8x32xf32>
    %c0_301 = arith.constant 0 : index
    %c0_302 = arith.constant 0 : index
    %478 = vector.load %arg16[%c0_301, %c0_302] : memref<8x32xf32, #tpu.memory_space<vmem>>, vector<8x32xf32>
    tpu.vector_store %arg16[%c0_301, %c0_302], %477 {strides = array<i32>} : memref<8x32xf32, #tpu.memory_space<vmem>>, vector<8x32xf32>,
    %cst_303 = arith.constant 1.000000e+00 : f32
    %479 = vector.broadcast %cst_303 : f32 to vector<8x32xf32>
    %480 = arith.cmpf ogt, %477, %479 : vector<8x32xf32>
    %481 = arith.extui %480 : vector<8x32xi1> to vector<8x32xi32>
    %482 = arith.sitofp %481 : vector<8x32xi32> to vector<8x32xf32>
    %c0_304 = arith.constant 0 : index
    %c0_305 = arith.constant 0 : index
    %483 = vector.load %arg17[%c0_304, %c0_305] : memref<8x32xf32, #tpu.memory_space<vmem>>, vector<8x32xf32>
    tpu.vector_store %arg17[%c0_304, %c0_305], %482 {strides = array<i32>} : memref<8x32xf32, #tpu.memory_space<vmem>>, vector<8x32xf32>,
    %484 = arith.truncf %482 : vector<8x32xf32> to vector<8x32xbf16>
    %cst_306 = arith.constant dense<0.000000e+00> : vector<8x32xf32>
    %485 = tpu.matmul %484, %11, %cst_306 {dimension_numbers = #tpu.dot_dimension_numbers<[1], [0], [0], [1], [0, 0, 1, 1], [], []>} : vector<8x32xbf16>, vector<32x32xbf16>, vector<8x32xf32> -> vector<8x32xf32>
    %c0_307 = arith.constant 0 : index
    %c0_308 = arith.constant 0 : index
    %486 = vector.load %arg15[%c0_307, %c0_308] : memref<8x32xf32, #tpu.memory_space<vmem>>, vector<8x32xf32>
    %cst_309 = arith.constant 0.899999976 : f32
    %487 = vector.broadcast %cst_309 : f32 to vector<8x32xf32>
    %488 = arith.mulf %487, %486 : vector<8x32xf32>
    %489 = arith.addf %488, %468 : vector<8x32xf32>
    %490 = arith.subf %489, %485 : vector<8x32xf32>
    %cst_310 = arith.constant 1.000000e+00 : f32
    %491 = vector.broadcast %cst_310 : f32 to vector<8x32xf32>
    %492 = arith.mulf %448, %491 : vector<8x32xf32>
    %493 = arith.subf %490, %492 : vector<8x32xf32>
    %c0_311 = arith.constant 0 : index
    %c0_312 = arith.constant 0 : index
    %494 = vector.load %arg15[%c0_311, %c0_312] : memref<8x32xf32, #tpu.memory_space<vmem>>, vector<8x32xf32>
    tpu.vector_store %arg15[%c0_311, %c0_312], %493 {strides = array<i32>} : memref<8x32xf32, #tpu.memory_space<vmem>>, vector<8x32xf32>,
    %cst_313 = arith.constant 1.000000e+00 : f32
    %495 = vector.broadcast %cst_313 : f32 to vector<8x32xf32>
    %496 = arith.cmpf ogt, %493, %495 : vector<8x32xf32>
    %497 = arith.extui %496 : vector<8x32xi1> to vector<8x32xi32>
    %498 = arith.sitofp %497 : vector<8x32xi32> to vector<8x32xf32>
    %499 = arith.index_cast %443 : i32 to index
    %c0_314 = arith.constant 0 : index
    %500 = vector.load %arg12[%499, %c0_314] : memref<64x32xf32, #tpu.memory_space<vmem>>, vector<8x32xf32>
    tpu.vector_store %arg12[%499, %c0_314], %498 {strides = array<i32>} : memref<64x32xf32, #tpu.memory_space<vmem>>, vector<8x32xf32>,
    %501 = arith.truncf %498 : vector<8x32xf32> to vector<8x32xbf16>
    %c0_315 = arith.constant 0 : index
    %c32_316 = arith.constant 32 : index
    %502 = vector.load %arg13[%c0_315, %c32_316] : memref<8x64xbf16, #tpu.memory_space<vmem>>, vector<8x32xbf16>
    tpu.vector_store %arg13[%c0_315, %c32_316], %501 {strides = array<i32>} : memref<8x64xbf16, #tpu.memory_space<vmem>>, vector<8x32xbf16>,
    %c8_i32_317 = arith.constant 8 : i32
    %c0_318 = arith.constant 0 : index
    %c0_319 = arith.constant 0 : index
    %503 = vector.load %arg12[%c0_318, %c0_319] : memref<64x32xf32, #tpu.memory_space<vmem>>, vector<64x32xf32>
    %504 = arith.truncf %503 : vector<64x32xf32> to vector<64x32xbf16>
    %c0_320 = arith.constant 0 : index
    %c0_321 = arith.constant 0 : index
    %505 = vector.load %arg7[%c0_320, %c0_321] : memref<32x8xbf16, #tpu.memory_space<vmem>>, vector<32x8xbf16>
    %cst_322 = arith.constant dense<0.000000e+00> : vector<64x8xf32>
    %506 = tpu.matmul %504, %505, %cst_322 {dimension_numbers = #tpu.dot_dimension_numbers<[1], [0], [0], [1], [0, 0, 1, 1], [], []>} : vector<64x32xbf16>, vector<32x8xbf16>, vector<64x8xf32> -> vector<64x8xf32>
    %c0_323 = arith.constant 0 : index
    %c0_324 = arith.constant 0 : index
    %507 = vector.load %arg8[%c0_323, %c0_324] : memref<1x8xf32, #tpu.memory_space<vmem>>, vector<1x8xf32>
    %508 = vector.broadcast %507 : vector<1x8xf32> to vector<64x8xf32>
    %509 = arith.addf %506, %508 : vector<64x8xf32>
    %c0_325 = arith.constant 0 : index
    %c0_326 = arith.constant 0 : index
    %510 = vector.load %arg11[%c0_325, %c0_326] : memref<64x8xf32, #tpu.memory_space<vmem>>, vector<64x8xf32>
    tpu.vector_store %arg11[%c0_325, %c0_326], %509 {strides = array<i32>} : memref<64x8xf32, #tpu.memory_space<vmem>>, vector<64x8xf32>,
    %c0_i32_327 = arith.constant 0 : i32
    %c8_i32_328 = arith.constant 8 : i32
    %511 = arith.muli %c0_i32_327, %c8_i32_328 : i32
    %512 = tpu.assume_multiple %511, 8 : i32
    %c0_329 = arith.constant 0 : index
    %c0_330 = arith.constant 0 : index
    %513 = vector.load %arg18[%c0_329, %c0_330] : memref<8x8xf32, #tpu.memory_space<vmem>>, vector<8x8xf32>
    %cst_331 = arith.constant 1.000000e+00 : f32
    %514 = vector.broadcast %cst_331 : f32 to vector<8x8xf32>
    %515 = arith.cmpf ogt, %513, %514 : vector<8x8xf32>
    %516 = arith.extui %515 : vector<8x8xi1> to vector<8x8xi32>
    %517 = arith.sitofp %516 : vector<8x8xi32> to vector<8x8xf32>
    %cst_332 = arith.constant 0.899999976 : f32
    %518 = vector.broadcast %cst_332 : f32 to vector<8x8xf32>
    %519 = arith.mulf %518, %513 : vector<8x8xf32>
    %520 = arith.index_cast %512 : i32 to index
    %c0_333 = arith.constant 0 : index
    %521 = vector.load %arg11[%520, %c0_333] : memref<64x8xf32, #tpu.memory_space<vmem>>, vector<8x8xf32>
    %522 = arith.addf %519, %521 : vector<8x8xf32>
    %cst_334 = arith.constant 1.000000e+00 : f32
    %523 = vector.broadcast %cst_334 : f32 to vector<8x8xf32>
    %524 = arith.mulf %517, %523 : vector<8x8xf32>
    %525 = arith.subf %522, %524 : vector<8x8xf32>
    %c0_335 = arith.constant 0 : index
    %c0_336 = arith.constant 0 : index
    %526 = vector.load %arg18[%c0_335, %c0_336] : memref<8x8xf32, #tpu.memory_space<vmem>>, vector<8x8xf32>
    tpu.vector_store %arg18[%c0_335, %c0_336], %525 {strides = array<i32>} : memref<8x8xf32, #tpu.memory_space<vmem>>, vector<8x8xf32>,
    %cst_337 = arith.constant 1.000000e+00 : f32
    %527 = vector.broadcast %cst_337 : f32 to vector<8x8xf32>
    %528 = arith.cmpf ogt, %525, %527 : vector<8x8xf32>
    %529 = arith.extui %528 : vector<8x8xi1> to vector<8x8xi32>
    %530 = arith.sitofp %529 : vector<8x8xi32> to vector<8x8xf32>
    %531 = arith.index_cast %512 : i32 to index
    %c0_338 = arith.constant 0 : index
    %532 = vector.load %arg9[%531, %c0_338] : memref<64x8xf32, #tpu.memory_space<vmem>>, vector<8x8xf32>
    tpu.vector_store %arg9[%531, %c0_338], %530 {strides = array<i32>} : memref<64x8xf32, #tpu.memory_space<vmem>>, vector<8x8xf32>,
    %c1_i32_339 = arith.constant 1 : i32
    %c8_i32_340 = arith.constant 8 : i32
    %533 = arith.muli %c1_i32_339, %c8_i32_340 : i32
    %534 = tpu.assume_multiple %533, 8 : i32
    %c0_341 = arith.constant 0 : index
    %c0_342 = arith.constant 0 : index
    %535 = vector.load %arg18[%c0_341, %c0_342] : memref<8x8xf32, #tpu.memory_space<vmem>>, vector<8x8xf32>
    %cst_343 = arith.constant 1.000000e+00 : f32
    %536 = vector.broadcast %cst_343 : f32 to vector<8x8xf32>
    %537 = arith.cmpf ogt, %535, %536 : vector<8x8xf32>
    %538 = arith.extui %537 : vector<8x8xi1> to vector<8x8xi32>
    %539 = arith.sitofp %538 : vector<8x8xi32> to vector<8x8xf32>
    %cst_344 = arith.constant 0.899999976 : f32
    %540 = vector.broadcast %cst_344 : f32 to vector<8x8xf32>
    %541 = arith.mulf %540, %535 : vector<8x8xf32>
    %542 = arith.index_cast %534 : i32 to index
    %c0_345 = arith.constant 0 : index
    %543 = vector.load %arg11[%542, %c0_345] : memref<64x8xf32, #tpu.memory_space<vmem>>, vector<8x8xf32>
    %544 = arith.addf %541, %543 : vector<8x8xf32>
    %cst_346 = arith.constant 1.000000e+00 : f32
    %545 = vector.broadcast %cst_346 : f32 to vector<8x8xf32>
    %546 = arith.mulf %539, %545 : vector<8x8xf32>
    %547 = arith.subf %544, %546 : vector<8x8xf32>
    %c0_347 = arith.constant 0 : index
    %c0_348 = arith.constant 0 : index
    %548 = vector.load %arg18[%c0_347, %c0_348] : memref<8x8xf32, #tpu.memory_space<vmem>>, vector<8x8xf32>
    tpu.vector_store %arg18[%c0_347, %c0_348], %547 {strides = array<i32>} : memref<8x8xf32, #tpu.memory_space<vmem>>, vector<8x8xf32>,
    %cst_349 = arith.constant 1.000000e+00 : f32
    %549 = vector.broadcast %cst_349 : f32 to vector<8x8xf32>
    %550 = arith.cmpf ogt, %547, %549 : vector<8x8xf32>
    %551 = arith.extui %550 : vector<8x8xi1> to vector<8x8xi32>
    %552 = arith.sitofp %551 : vector<8x8xi32> to vector<8x8xf32>
    %553 = arith.index_cast %534 : i32 to index
    %c0_350 = arith.constant 0 : index
    %554 = vector.load %arg9[%553, %c0_350] : memref<64x8xf32, #tpu.memory_space<vmem>>, vector<8x8xf32>
    tpu.vector_store %arg9[%553, %c0_350], %552 {strides = array<i32>} : memref<64x8xf32, #tpu.memory_space<vmem>>, vector<8x8xf32>,
    %c2_i32_351 = arith.constant 2 : i32
    %c8_i32_352 = arith.constant 8 : i32
    %555 = arith.muli %c2_i32_351, %c8_i32_352 : i32
    %556 = tpu.assume_multiple %555, 8 : i32
    %c0_353 = arith.constant 0 : index
    %c0_354 = arith.constant 0 : index
    %557 = vector.load %arg18[%c0_353, %c0_354] : memref<8x8xf32, #tpu.memory_space<vmem>>, vector<8x8xf32>
    %cst_355 = arith.constant 1.000000e+00 : f32
    %558 = vector.broadcast %cst_355 : f32 to vector<8x8xf32>
    %559 = arith.cmpf ogt, %557, %558 : vector<8x8xf32>
    %560 = arith.extui %559 : vector<8x8xi1> to vector<8x8xi32>
    %561 = arith.sitofp %560 : vector<8x8xi32> to vector<8x8xf32>
    %cst_356 = arith.constant 0.899999976 : f32
    %562 = vector.broadcast %cst_356 : f32 to vector<8x8xf32>
    %563 = arith.mulf %562, %557 : vector<8x8xf32>
    %564 = arith.index_cast %556 : i32 to index
    %c0_357 = arith.constant 0 : index
    %565 = vector.load %arg11[%564, %c0_357] : memref<64x8xf32, #tpu.memory_space<vmem>>, vector<8x8xf32>
    %566 = arith.addf %563, %565 : vector<8x8xf32>
    %cst_358 = arith.constant 1.000000e+00 : f32
    %567 = vector.broadcast %cst_358 : f32 to vector<8x8xf32>
    %568 = arith.mulf %561, %567 : vector<8x8xf32>
    %569 = arith.subf %566, %568 : vector<8x8xf32>
    %c0_359 = arith.constant 0 : index
    %c0_360 = arith.constant 0 : index
    %570 = vector.load %arg18[%c0_359, %c0_360] : memref<8x8xf32, #tpu.memory_space<vmem>>, vector<8x8xf32>
    tpu.vector_store %arg18[%c0_359, %c0_360], %569 {strides = array<i32>} : memref<8x8xf32, #tpu.memory_space<vmem>>, vector<8x8xf32>,
    %cst_361 = arith.constant 1.000000e+00 : f32
    %571 = vector.broadcast %cst_361 : f32 to vector<8x8xf32>
    %572 = arith.cmpf ogt, %569, %571 : vector<8x8xf32>
    %573 = arith.extui %572 : vector<8x8xi1> to vector<8x8xi32>
    %574 = arith.sitofp %573 : vector<8x8xi32> to vector<8x8xf32>
    %575 = arith.index_cast %556 : i32 to index
    %c0_362 = arith.constant 0 : index
    %576 = vector.load %arg9[%575, %c0_362] : memref<64x8xf32, #tpu.memory_space<vmem>>, vector<8x8xf32>
    tpu.vector_store %arg9[%575, %c0_362], %574 {strides = array<i32>} : memref<64x8xf32, #tpu.memory_space<vmem>>, vector<8x8xf32>,
    %c3_i32_363 = arith.constant 3 : i32
    %c8_i32_364 = arith.constant 8 : i32
    %577 = arith.muli %c3_i32_363, %c8_i32_364 : i32
    %578 = tpu.assume_multiple %577, 8 : i32
    %c0_365 = arith.constant 0 : index
    %c0_366 = arith.constant 0 : index
    %579 = vector.load %arg18[%c0_365, %c0_366] : memref<8x8xf32, #tpu.memory_space<vmem>>, vector<8x8xf32>
    %cst_367 = arith.constant 1.000000e+00 : f32
    %580 = vector.broadcast %cst_367 : f32 to vector<8x8xf32>
    %581 = arith.cmpf ogt, %579, %580 : vector<8x8xf32>
    %582 = arith.extui %581 : vector<8x8xi1> to vector<8x8xi32>
    %583 = arith.sitofp %582 : vector<8x8xi32> to vector<8x8xf32>
    %cst_368 = arith.constant 0.899999976 : f32
    %584 = vector.broadcast %cst_368 : f32 to vector<8x8xf32>
    %585 = arith.mulf %584, %579 : vector<8x8xf32>
    %586 = arith.index_cast %578 : i32 to index
    %c0_369 = arith.constant 0 : index
    %587 = vector.load %arg11[%586, %c0_369] : memref<64x8xf32, #tpu.memory_space<vmem>>, vector<8x8xf32>
    %588 = arith.addf %585, %587 : vector<8x8xf32>
    %cst_370 = arith.constant 1.000000e+00 : f32
    %589 = vector.broadcast %cst_370 : f32 to vector<8x8xf32>
    %590 = arith.mulf %583, %589 : vector<8x8xf32>
    %591 = arith.subf %588, %590 : vector<8x8xf32>
    %c0_371 = arith.constant 0 : index
    %c0_372 = arith.constant 0 : index
    %592 = vector.load %arg18[%c0_371, %c0_372] : memref<8x8xf32, #tpu.memory_space<vmem>>, vector<8x8xf32>
    tpu.vector_store %arg18[%c0_371, %c0_372], %591 {strides = array<i32>} : memref<8x8xf32, #tpu.memory_space<vmem>>, vector<8x8xf32>,
    %cst_373 = arith.constant 1.000000e+00 : f32
    %593 = vector.broadcast %cst_373 : f32 to vector<8x8xf32>
    %594 = arith.cmpf ogt, %591, %593 : vector<8x8xf32>
    %595 = arith.extui %594 : vector<8x8xi1> to vector<8x8xi32>
    %596 = arith.sitofp %595 : vector<8x8xi32> to vector<8x8xf32>
    %597 = arith.index_cast %578 : i32 to index
    %c0_374 = arith.constant 0 : index
    %598 = vector.load %arg9[%597, %c0_374] : memref<64x8xf32, #tpu.memory_space<vmem>>, vector<8x8xf32>
    tpu.vector_store %arg9[%597, %c0_374], %596 {strides = array<i32>} : memref<64x8xf32, #tpu.memory_space<vmem>>, vector<8x8xf32>,
    %c4_i32_375 = arith.constant 4 : i32
    %c8_i32_376 = arith.constant 8 : i32
    %599 = arith.muli %c4_i32_375, %c8_i32_376 : i32
    %600 = tpu.assume_multiple %599, 8 : i32
    %c0_377 = arith.constant 0 : index
    %c0_378 = arith.constant 0 : index
    %601 = vector.load %arg18[%c0_377, %c0_378] : memref<8x8xf32, #tpu.memory_space<vmem>>, vector<8x8xf32>
    %cst_379 = arith.constant 1.000000e+00 : f32
    %602 = vector.broadcast %cst_379 : f32 to vector<8x8xf32>
    %603 = arith.cmpf ogt, %601, %602 : vector<8x8xf32>
    %604 = arith.extui %603 : vector<8x8xi1> to vector<8x8xi32>
    %605 = arith.sitofp %604 : vector<8x8xi32> to vector<8x8xf32>
    %cst_380 = arith.constant 0.899999976 : f32
    %606 = vector.broadcast %cst_380 : f32 to vector<8x8xf32>
    %607 = arith.mulf %606, %601 : vector<8x8xf32>
    %608 = arith.index_cast %600 : i32 to index
    %c0_381 = arith.constant 0 : index
    %609 = vector.load %arg11[%608, %c0_381] : memref<64x8xf32, #tpu.memory_space<vmem>>, vector<8x8xf32>
    %610 = arith.addf %607, %609 : vector<8x8xf32>
    %cst_382 = arith.constant 1.000000e+00 : f32
    %611 = vector.broadcast %cst_382 : f32 to vector<8x8xf32>
    %612 = arith.mulf %605, %611 : vector<8x8xf32>
    %613 = arith.subf %610, %612 : vector<8x8xf32>
    %c0_383 = arith.constant 0 : index
    %c0_384 = arith.constant 0 : index
    %614 = vector.load %arg18[%c0_383, %c0_384] : memref<8x8xf32, #tpu.memory_space<vmem>>, vector<8x8xf32>
    tpu.vector_store %arg18[%c0_383, %c0_384], %613 {strides = array<i32>} : memref<8x8xf32, #tpu.memory_space<vmem>>, vector<8x8xf32>,
    %cst_385 = arith.constant 1.000000e+00 : f32
    %615 = vector.broadcast %cst_385 : f32 to vector<8x8xf32>
    %616 = arith.cmpf ogt, %613, %615 : vector<8x8xf32>
    %617 = arith.extui %616 : vector<8x8xi1> to vector<8x8xi32>
    %618 = arith.sitofp %617 : vector<8x8xi32> to vector<8x8xf32>
    %619 = arith.index_cast %600 : i32 to index
    %c0_386 = arith.constant 0 : index
    %620 = vector.load %arg9[%619, %c0_386] : memref<64x8xf32, #tpu.memory_space<vmem>>, vector<8x8xf32>
    tpu.vector_store %arg9[%619, %c0_386], %618 {strides = array<i32>} : memref<64x8xf32, #tpu.memory_space<vmem>>, vector<8x8xf32>,
    %c5_i32_387 = arith.constant 5 : i32
    %c8_i32_388 = arith.constant 8 : i32
    %621 = arith.muli %c5_i32_387, %c8_i32_388 : i32
    %622 = tpu.assume_multiple %621, 8 : i32
    %c0_389 = arith.constant 0 : index
    %c0_390 = arith.constant 0 : index
    %623 = vector.load %arg18[%c0_389, %c0_390] : memref<8x8xf32, #tpu.memory_space<vmem>>, vector<8x8xf32>
    %cst_391 = arith.constant 1.000000e+00 : f32
    %624 = vector.broadcast %cst_391 : f32 to vector<8x8xf32>
    %625 = arith.cmpf ogt, %623, %624 : vector<8x8xf32>
    %626 = arith.extui %625 : vector<8x8xi1> to vector<8x8xi32>
    %627 = arith.sitofp %626 : vector<8x8xi32> to vector<8x8xf32>
    %cst_392 = arith.constant 0.899999976 : f32
    %628 = vector.broadcast %cst_392 : f32 to vector<8x8xf32>
    %629 = arith.mulf %628, %623 : vector<8x8xf32>
    %630 = arith.index_cast %622 : i32 to index
    %c0_393 = arith.constant 0 : index
    %631 = vector.load %arg11[%630, %c0_393] : memref<64x8xf32, #tpu.memory_space<vmem>>, vector<8x8xf32>
    %632 = arith.addf %629, %631 : vector<8x8xf32>
    %cst_394 = arith.constant 1.000000e+00 : f32
    %633 = vector.broadcast %cst_394 : f32 to vector<8x8xf32>
    %634 = arith.mulf %627, %633 : vector<8x8xf32>
    %635 = arith.subf %632, %634 : vector<8x8xf32>
    %c0_395 = arith.constant 0 : index
    %c0_396 = arith.constant 0 : index
    %636 = vector.load %arg18[%c0_395, %c0_396] : memref<8x8xf32, #tpu.memory_space<vmem>>, vector<8x8xf32>
    tpu.vector_store %arg18[%c0_395, %c0_396], %635 {strides = array<i32>} : memref<8x8xf32, #tpu.memory_space<vmem>>, vector<8x8xf32>,
    %cst_397 = arith.constant 1.000000e+00 : f32
    %637 = vector.broadcast %cst_397 : f32 to vector<8x8xf32>
    %638 = arith.cmpf ogt, %635, %637 : vector<8x8xf32>
    %639 = arith.extui %638 : vector<8x8xi1> to vector<8x8xi32>
    %640 = arith.sitofp %639 : vector<8x8xi32> to vector<8x8xf32>
    %641 = arith.index_cast %622 : i32 to index
    %c0_398 = arith.constant 0 : index
    %642 = vector.load %arg9[%641, %c0_398] : memref<64x8xf32, #tpu.memory_space<vmem>>, vector<8x8xf32>
    tpu.vector_store %arg9[%641, %c0_398], %640 {strides = array<i32>} : memref<64x8xf32, #tpu.memory_space<vmem>>, vector<8x8xf32>,
    %c6_i32_399 = arith.constant 6 : i32
    %c8_i32_400 = arith.constant 8 : i32
    %643 = arith.muli %c6_i32_399, %c8_i32_400 : i32
    %644 = tpu.assume_multiple %643, 8 : i32
    %c0_401 = arith.constant 0 : index
    %c0_402 = arith.constant 0 : index
    %645 = vector.load %arg18[%c0_401, %c0_402] : memref<8x8xf32, #tpu.memory_space<vmem>>, vector<8x8xf32>
    %cst_403 = arith.constant 1.000000e+00 : f32
    %646 = vector.broadcast %cst_403 : f32 to vector<8x8xf32>
    %647 = arith.cmpf ogt, %645, %646 : vector<8x8xf32>
    %648 = arith.extui %647 : vector<8x8xi1> to vector<8x8xi32>
    %649 = arith.sitofp %648 : vector<8x8xi32> to vector<8x8xf32>
    %cst_404 = arith.constant 0.899999976 : f32
    %650 = vector.broadcast %cst_404 : f32 to vector<8x8xf32>
    %651 = arith.mulf %650, %645 : vector<8x8xf32>
    %652 = arith.index_cast %644 : i32 to index
    %c0_405 = arith.constant 0 : index
    %653 = vector.load %arg11[%652, %c0_405] : memref<64x8xf32, #tpu.memory_space<vmem>>, vector<8x8xf32>
    %654 = arith.addf %651, %653 : vector<8x8xf32>
    %cst_406 = arith.constant 1.000000e+00 : f32
    %655 = vector.broadcast %cst_406 : f32 to vector<8x8xf32>
    %656 = arith.mulf %649, %655 : vector<8x8xf32>
    %657 = arith.subf %654, %656 : vector<8x8xf32>
    %c0_407 = arith.constant 0 : index
    %c0_408 = arith.constant 0 : index
    %658 = vector.load %arg18[%c0_407, %c0_408] : memref<8x8xf32, #tpu.memory_space<vmem>>, vector<8x8xf32>
    tpu.vector_store %arg18[%c0_407, %c0_408], %657 {strides = array<i32>} : memref<8x8xf32, #tpu.memory_space<vmem>>, vector<8x8xf32>,
    %cst_409 = arith.constant 1.000000e+00 : f32
    %659 = vector.broadcast %cst_409 : f32 to vector<8x8xf32>
    %660 = arith.cmpf ogt, %657, %659 : vector<8x8xf32>
    %661 = arith.extui %660 : vector<8x8xi1> to vector<8x8xi32>
    %662 = arith.sitofp %661 : vector<8x8xi32> to vector<8x8xf32>
    %663 = arith.index_cast %644 : i32 to index
    %c0_410 = arith.constant 0 : index
    %664 = vector.load %arg9[%663, %c0_410] : memref<64x8xf32, #tpu.memory_space<vmem>>, vector<8x8xf32>
    tpu.vector_store %arg9[%663, %c0_410], %662 {strides = array<i32>} : memref<64x8xf32, #tpu.memory_space<vmem>>, vector<8x8xf32>,
    %c7_i32_411 = arith.constant 7 : i32
    %c8_i32_412 = arith.constant 8 : i32
    %665 = arith.muli %c7_i32_411, %c8_i32_412 : i32
    %666 = tpu.assume_multiple %665, 8 : i32
    %c0_413 = arith.constant 0 : index
    %c0_414 = arith.constant 0 : index
    %667 = vector.load %arg18[%c0_413, %c0_414] : memref<8x8xf32, #tpu.memory_space<vmem>>, vector<8x8xf32>
    %cst_415 = arith.constant 1.000000e+00 : f32
    %668 = vector.broadcast %cst_415 : f32 to vector<8x8xf32>
    %669 = arith.cmpf ogt, %667, %668 : vector<8x8xf32>
    %670 = arith.extui %669 : vector<8x8xi1> to vector<8x8xi32>
    %671 = arith.sitofp %670 : vector<8x8xi32> to vector<8x8xf32>
    %cst_416 = arith.constant 0.899999976 : f32
    %672 = vector.broadcast %cst_416 : f32 to vector<8x8xf32>
    %673 = arith.mulf %672, %667 : vector<8x8xf32>
    %674 = arith.index_cast %666 : i32 to index
    %c0_417 = arith.constant 0 : index
    %675 = vector.load %arg11[%674, %c0_417] : memref<64x8xf32, #tpu.memory_space<vmem>>, vector<8x8xf32>
    %676 = arith.addf %673, %675 : vector<8x8xf32>
    %cst_418 = arith.constant 1.000000e+00 : f32
    %677 = vector.broadcast %cst_418 : f32 to vector<8x8xf32>
    %678 = arith.mulf %671, %677 : vector<8x8xf32>
    %679 = arith.subf %676, %678 : vector<8x8xf32>
    %c0_419 = arith.constant 0 : index
    %c0_420 = arith.constant 0 : index
    %680 = vector.load %arg18[%c0_419, %c0_420] : memref<8x8xf32, #tpu.memory_space<vmem>>, vector<8x8xf32>
    tpu.vector_store %arg18[%c0_419, %c0_420], %679 {strides = array<i32>} : memref<8x8xf32, #tpu.memory_space<vmem>>, vector<8x8xf32>,
    %cst_421 = arith.constant 1.000000e+00 : f32
    %681 = vector.broadcast %cst_421 : f32 to vector<8x8xf32>
    %682 = arith.cmpf ogt, %679, %681 : vector<8x8xf32>
    %683 = arith.extui %682 : vector<8x8xi1> to vector<8x8xi32>
    %684 = arith.sitofp %683 : vector<8x8xi32> to vector<8x8xf32>
    %685 = arith.index_cast %666 : i32 to index
    %c0_422 = arith.constant 0 : index
    %686 = vector.load %arg9[%685, %c0_422] : memref<64x8xf32, #tpu.memory_space<vmem>>, vector<8x8xf32>
    tpu.vector_store %arg9[%685, %c0_422], %684 {strides = array<i32>} : memref<64x8xf32, #tpu.memory_space<vmem>>, vector<8x8xf32>,
    %c8_i32_423 = arith.constant 8 : i32
    return
  }
  func.func @transform_0(%arg0: i32) -> (i32, i32) {
    %c0_i32 = arith.constant 0 : i32
    %c0_i32_0 = arith.constant 0 : i32
    return %arg0, %c0_i32 : i32, i32
  }
  func.func @transform_1(%arg0: i32) -> (i32, i32) {
    %c0_i32 = arith.constant 0 : i32
    %c0_i32_0 = arith.constant 0 : i32
    %c0_i32_1 = arith.constant 0 : i32
    return %c0_i32, %c0_i32_0 : i32, i32
  }
  func.func @transform_2(%arg0: i32) -> (i32, i32) {
    %c0_i32 = arith.constant 0 : i32
    %c0_i32_0 = arith.constant 0 : i32
    %c0_i32_1 = arith.constant 0 : i32
    return %c0_i32, %c0_i32_0 : i32, i32
  }
  func.func @transform_3(%arg0: i32) -> (i32, i32) {
    %c0_i32 = arith.constant 0 : i32
    %c0_i32_0 = arith.constant 0 : i32
    %c0_i32_1 = arith.constant 0 : i32
    return %c0_i32, %c0_i32_0 : i32, i32
  }
  func.func @transform_4(%arg0: i32) -> (i32, i32) {
    %c0_i32 = arith.constant 0 : i32
    %c0_i32_0 = arith.constant 0 : i32
    %c0_i32_1 = arith.constant 0 : i32
    return %c0_i32, %c0_i32_0 : i32, i32
  }
  func.func @transform_5(%arg0: i32) -> (i32, i32) {
    %c0_i32 = arith.constant 0 : i32
    %c0_i32_0 = arith.constant 0 : i32
    %c0_i32_1 = arith.constant 0 : i32
    return %c0_i32, %c0_i32_0 : i32, i32
  }
  func.func @transform_6(%arg0: i32) -> (i32, i32) {
    %c0_i32 = arith.constant 0 : i32
    %c0_i32_0 = arith.constant 0 : i32
    %c0_i32_1 = arith.constant 0 : i32
    return %c0_i32, %c0_i32_0 : i32, i32
  }
  func.func @transform_7(%arg0: i32) -> (i32, i32) {
    %c0_i32 = arith.constant 0 : i32
    %c0_i32_0 = arith.constant 0 : i32
    %c0_i32_1 = arith.constant 0 : i32
    return %c0_i32, %c0_i32_0 : i32, i32
  }
  func.func @transform_8(%arg0: i32) -> (i32, i32) {
    %c0_i32 = arith.constant 0 : i32
    %c0_i32_0 = arith.constant 0 : i32
    return %arg0, %c0_i32 : i32, i32
  }
}

</mosaic_0001>

<bundles_post_ra>
// kernel: ahpc_forward.1
= control target key start
LH: loop header
LB: loop body
LE: loop exit
PB: predicated region body
PF: predicated region fallthrough
CT: control target
= control target key end

     0   :  { %vm34_vm0 = vcmask 261120   ;;  %vm41_vm1 = vcmask 519168   ;;  %v1209_v1 = vmov 0.0   ;;  %v1210_v3 = vmov 0   ;;  %s1211_s22 = smov 96   ;;  %s1610_s1 = inlined_call_operand.vmem [shape: bf16[16,32], index: 1, kind: input, shape index: {}]   ;;  %s1611_s0 = inlined_call_operand.vmem [shape: bf16[64,16], index: 0, kind: input, shape index: {}]   ;;  %s1612_s2 = inlined_call_operand.vmem [shape: f32[1,32], index: 2, kind: input, shape index: {}]   ;;  %s1613_s3 = inlined_call_operand.vmem [shape: bf16[64,64], index: 3, kind: input, shape index: {}]   ;;  %s1614_s4 = inlined_call_operand.vmem [shape: f32[1,32], index: 4, kind: input, shape index: {}]   ;;  %s1615_s5 = inlined_call_operand.vmem [shape: bf16[32,32], index: 5, kind: input, shape index: {}]   ;;  %s1616_s6 = inlined_call_operand.vmem [shape: bf16[32,8], index: 6, kind: input, shape index: {}]   ;;  %s1617_s7 = inlined_call_operand.vmem [shape: f32[1,8], index: 7, kind: input, shape index: {}]   ;;  %s1618_s8 = inlined_call_operand.vmem [shape: f32[64,8], index: 8, kind: output, shape index: {}]  }
   0x1   :  { %v1190_v0 = vld [vmem:[%s1610_s1] sm:$0xff]  ;;  %35 = vst.msk [vmem:[#allocation6] sm:$0xff] %vm34_vm0, %v1209_v1  ;;  %vm83_vm2 = vcmask 130048   ;;  %v1187_v4 = vld [vmem:[%s1611_s0 + $0x8] sm:$0xff]  ;;  %v1280_v5 = vld [vmem:[%s1613_s3 + $0x18] sm:$0xff]  ;;  %vm162_vm4 = vcmask 257024  }
   0x2   :  { %v1186_v2 = vld [vmem:[%s1611_s0] sm:$0xff]  ;;  %42 = vst.msk [vmem:[#allocation5] sm:$0xf] %vm41_vm1, %v1210_v3  ;;  %103 = vmatpush.bf16.msra.mxu0 %v1190_v0  ;;  %1199 = vmatpush.bf16.msra.mxu1 %v1190_v0  ;;  %v1288_v6 = vld [vmem:[%s1613_s3 + $0x10] sm:$0xff]  ;;  %v1296_v7 = vld [vmem:[%s1613_s3 + $0x8] sm:$0xff]  ;;  %vm189_vm5 = vcmask 523264  }
   0x3   :  { %36 = vst.msk [vmem:[#allocation7] sm:$0xff] %vm34_vm0, %v1209_v1  ;;  %1200 = vmatpush.bf16.msra.mxu2 %v1190_v0  ;;  %1201 = vmatpush.bf16.msra.mxu3 %v1190_v0  ;;  %v1302_v8 = vld [vmem:[%s1613_s3] sm:$0xff]  ;;  %v1188_v28 = vld [vmem:[%s1611_s0 + $0x10] sm:$0xff]  ;;  %v1336_v29 = vld [vmem:[%s1615_s5 + $0x8] sm:$0xff]  ;;  %vm269_vm8 = vcmask 519424  }
   0x4   :  { %37 = vst.msk [vmem:[#allocation8] sm:$0xff] %vm34_vm0, %v1209_v1  ;;  %v1313_v9 = vld [vmem:[%s1612_s2] ss:$0 sm:$0xff]  ;;  %v1189_v57 = vld [vmem:[%s1611_s0 + $0x18] sm:$0xff] }
   0x5   :  { %38 = vst.msk [vmem:[#allocation9] sm:$0xff] %vm34_vm0, %v1209_v1  ;;  %1083 = vmatmul.msk.bf16.vlgmr.msra.gmra.mxu0 %vm83_vm2, %v1186_v2  ;;  %1084 = vmatmul.msk.bf16.vlgmr.msra.gmra.mxu1 %vm83_vm2, %v1187_v4  ;;  %v1346_v32 = vld [vmem:[%s1615_s5] sm:$0xff] }
   0x6   :  { %197 = vmatpush.bf16.msrb.mxu1 %v1280_v5  ;;  %713 = vmatpush.bf16.msrb.mxu0 %v1280_v5  ;;  %v1367_v45 = vld [vmem:[%s1614_s4] ss:$0 sm:$0xff]  ;;  %s1212_s4 = smov 32  }
   0x7   :  { %293 = vmatpush.bf16.msrb.mxu3 %v1280_v5  ;;  %1085 = vmatmul.msk.bf16.vlgmr.msra.gmra.mxu2 %vm83_vm2, %v1188_v28 }
   0x8   :  { %v153_v12 = vld [vmem:[#allocation6] sm:$0xff]  ;;  %243 = vmatpush.bf16.msrb.mxu2 %v1336_v29  ;;  %1086 = vmatmul.msk.bf16.vlgmr.msra.gmra.mxu3 %vm83_vm2, %v1189_v57 }
   0x9   :  { %v150_v13 = vld [vmem:[#allocation5] sm:$0xf]  ;;  %v154_v14 = vmul.f32 0.9, %v153_v12 }
   0xa   :  { %198 = vmatpush.bf16.msrb.mxu1 %v1288_v6  ;;  %714 = vmatpush.bf16.msrb.mxu0 %v1288_v6  ;;  %v151_v16 = vunpack.c.l.bf16 %v150_v13  ;;  %v250_v46 = vld [vmem:[#allocation7] sm:$0xff] }
   0xb   :  { %294 = vmatpush.bf16.msrb.mxu3 %v1288_v6  ;;  %v207_v33 = vld [vmem:[#allocation8] sm:$0xff]  ;;  %v251_v48 = vmul.f32 0.9, %v250_v46 }
   0xc   :  { %244 = vmatpush.bf16.msrb.mxu2 %v1346_v32  ;;  %v208_v36 = vmul.f32 0.85, %v207_v33  ;;  %v214_v37 = vld [vmem:[#allocation9] sm:$0xff] }
   0xe   :  { %199 = vmatpush.bf16.msrb.mxu1 %v1296_v7  ;;  %715 = vmatpush.bf16.msrb.mxu0 %v1296_v7 }
   0xf   :  { %295 = vmatpush.bf16.msrb.mxu3 %v1296_v7 }
  0x10   :  { %327 = vmatpush.bf16.msra.mxu2 %v1336_v29 }
  0x12   :  { %200 = vmatpush.bf16.msrb.mxu1 %v1302_v8  ;;  %716 = vmatpush.bf16.msrb.mxu0 %v1302_v8 }
  0x13   :  { %296 = vmatpush.bf16.msrb.mxu3 %v1302_v8 }
  0x14   :  { %328 = vmatpush.bf16.msra.mxu2 %v1346_v32 }
  0x16   :  { %377 = vmatpush.bf16.msra.mxu1 %v1280_v5 }
  0x17   :  { %411 = vmatpush.bf16.msra.mxu3 %v1336_v29 }
  0x1a   :  { %378 = vmatpush.bf16.msra.mxu1 %v1288_v6 }
  0x1b   :  { %412 = vmatpush.bf16.msra.mxu3 %v1346_v32 }
  0x1e   :  { %379 = vmatpush.bf16.msra.mxu1 %v1296_v7 }
  0x22   :  { %380 = vmatpush.bf16.msra.mxu1 %v1302_v8 }
  0x82   :  { %v105_v10 = vpop.f32.mrf.mxu0  ;;  %v110_v24 = vpop.f32.mrf.mxu1 }
  0x83   :  { %v106_v11 = vadd.f32 %v1313_v9, %v105_v10  ;;  %v111_v25 = vadd.f32 %v1313_v9, %v110_v24 }
  0x85   :  { %126 = vst.msk [vmem:[#allocation2] sm:$0xff] %vm34_vm0, %v106_v11 }
  0x86   :  { %128 = vst.msk [vmem:[#allocation2 + $0x10] sm:$0xff] %vm34_vm0, %v111_v25 }
  0x8a   :  { %v107_v15 = vpop.f32.mrf.mxu0  ;;  %v112_v26 = vpop.f32.mrf.mxu1 }
  0x8b   :  { %v108_v17 = vadd.f32 %v1313_v9, %v107_v15  ;;  %v113_v27 = vadd.f32 %v1313_v9, %v112_v26  ;;  %v115_v34 = vpop.f32.mrf.mxu2  ;;  %v120_v11 = vpop.f32.mrf.mxu3 }
  0x8c   :  { %v152_v18 = vld [vmem:[#allocation2] sm:$0xff]  ;;  %v116_v35 = vadd.f32 %v1313_v9, %v115_v34  ;;  %v121_v12 = vadd.f32 %v1313_v9, %v120_v11 }
  0x8d   :  { %v155_v19 = vadd.f32 %v154_v14, %v152_v18  ;;  %127 = vst.msk [vmem:[#allocation2 + $0x8] sm:$0xff] %vm34_vm0, %v108_v17 }
  0x8e   :  { %129 = vst.msk [vmem:[#allocation2 + $0x18] sm:$0xff] %vm34_vm0, %v113_v27 }
  0x8f   :  { %v156_v20 = vsub.f32 %v155_v19, %v151_v16  ;;  %130 = vst.msk [vmem:[#allocation2 + $0x20] sm:$0xff] %vm34_vm0, %v116_v35 }
  0x90   :  { %132 = vst.msk [vmem:[#allocation2 + $0x30] sm:$0xff] %vm34_vm0, %v121_v12 }
  0x91   :  { %vm158_vm3 = vcmp.gt.f32.partialorder %v156_v20, 1.0  ;;  %157 = vst.msk [vmem:[#allocation6] sm:$0xff] %vm34_vm0, %v156_v20 }
  0x92   :  { %v1087_v21 = vsel %vm158_vm3, 1.0, %v1209_v1 }
  0x93   :  { %v161_v22 = vpack.c.bf16 %v1087_v21, %v1087_v21  ;;  %v117_v40 = vpop.f32.mrf.mxu2  ;;  %v122_v13 = vpop.f32.mrf.mxu3 }
  0x94   :  { %v118_v42 = vadd.f32 %v1313_v9, %v117_v40  ;;  %v274_v62 = vld [vmem:[#allocation2 + $0x8] sm:$0xff]  ;;  %v123_v14 = vadd.f32 %v1313_v9, %v122_v13 }
  0x95   :  { %163 = vst.msk [vmem:[#allocation5] sm:$0xf] %vm162_vm4, %v161_v22 }
  0x96   :  { %131 = vst.msk [vmem:[#allocation2 + $0x28] sm:$0xff] %vm34_vm0, %v118_v42 }
  0x97   :  { %133 = vst.msk [vmem:[#allocation2 + $0x38] sm:$0xff] %vm34_vm0, %v123_v14 }
  0x98   :  { %v275_v59 = vld [vmem:[#allocation6] sm:$0xff] }
  0x99   :  { %v276_v60 = vmul.f32 0.9, %v275_v59 }
  0x9b   :  { %v277_v0 = vadd.f32 %v276_v60, %v274_v62 }
  0x9c   :  { %v164_v23 = vld [vmem:[#allocation5] sm:$0xf] }
  0x9d   :  { %1104 = vmatmul.msk.bf16.vlgmr.msrb.gmra.mxu1 %vm189_vm5, %v164_v23 }
  0x9e   :  { %495 = vmatpush.bf16.msrb.mxu1 %v1336_v29 }
  0xa2   :  { %496 = vmatpush.bf16.msrb.mxu1 %v1346_v32 }
 0x11a   :  { %v202_v30 = vpop.f32.mrf.mxu1 }
 0x11b   :  { %210 = vrot.lane.b32.xlu0 %v202_v30, %s1211_s22  ;;  %v206_v47 = vadd.f32 %v1367_v45, %v202_v30 }
 0x11d   :  { %v252_v49 = vadd.f32 %v251_v48, %v206_v47 }
 0x122   :  { %v204_v31 = vpop.f32.mrf.mxu1 }
 0x123   :  { %255 = vrot.lane.b32.xlu0 %v151_v16, %s1211_s22 }
 0x18d   :  { %v211_v38 = vpop.permute.xlu0 %210 }
 0x18e   :  { %v213_v39 = vadd.f32 %v211_v38, %v208_v36 }
 0x190   :  { %v215_v41 = vsub.f32 %v213_v39, %v214_v37 }
 0x192   :  { %216 = vst.msk [vmem:[#allocation8] sm:$0xff] %vm34_vm0, %v215_v41  ;;  %vm217_vm6 = vcmp.gt.f32.partialorder %v215_v41, 1.0  ;;  %v358_v41 = vld [vmem:[#allocation2 + $0x10] sm:$0xff] }
 0x193   :  { %v1105_v43 = vsel %vm217_vm6, 1.0, %v1209_v1 }
 0x194   :  { %220 = vst.msk [vmem:[#allocation9] sm:$0xff] %vm34_vm0, %v1105_v43  ;;  %v221_v44 = vpack.c.bf16 %v1105_v43, %v1105_v43 }
 0x195   :  { %v256_v51 = vpop.permute.xlu0 %255 }
 0x196   :  { %1114 = vmatmul.msk.bf16.vlgmr.msrb.gmra.mxu2 %vm34_vm0, %v221_v44 }
 0x197   :  { %461 = vmatpush.bf16.msrb.mxu2 %v1280_v5 }
 0x199   :  { %v303_v17 = vld [vmem:[#allocation8] sm:$0xff] }
 0x19a   :  { %v304_v18 = vmul.f32 0.85, %v303_v17 }
 0x19b   :  { %462 = vmatpush.bf16.msrb.mxu2 %v1288_v6  ;;  %v310_v21 = vld [vmem:[#allocation9] sm:$0xff] }
 0x19f   :  { %463 = vmatpush.bf16.msrb.mxu2 %v1296_v7 }
 0x1a3   :  { %464 = vmatpush.bf16.msrb.mxu2 %v1302_v8 }
 0x219   :  { %v246_v50 = vpop.f32.mrf.mxu2 }
 0x21a   :  { %v253_v52 = vsub.f32 %v252_v49, %v246_v50 }
 0x21c   :  { %v258_v53 = vsub.f32 %v253_v52, %v256_v51 }
 0x21e   :  { %259 = vst.msk [vmem:[#allocation7] sm:$0xff] %vm34_vm0, %v258_v53  ;;  %vm260_vm7 = vcmp.gt.f32.partialorder %v258_v53, 1.0 }
 0x21f   :  { %v1115_v54 = vsel %vm260_vm7, 1.0, %v1209_v1 }
 0x220   :  { %v264_v55 = vpack.c.bf16 %v1115_v54, %v1115_v54  ;;  %263 = vst.msk [vmem:[#allocation4] sm:$0xff] %vm34_vm0, %v1115_v54 }
 0x221   :  { %v248_v56 = vpop.f32.mrf.mxu2 }
 0x222   :  { %266 = vrot.lane.b32.xlu1 %v264_v55, %s1212_s4 }
 0x225   :  { %v334_v24 = vld [vmem:[#allocation7] sm:$0xff] }
 0x226   :  { %v335_v26 = vmul.f32 0.9, %v334_v24 }
 0x294   :  { %v267_v58 = vpop.permute.xlu1 %266 }
 0x295   :  { %270 = vst.msk [vmem:[#allocation5] sm:$0xf] %vm269_vm8, %v267_v58 }
 0x29c   :  { %v271_v61 = vld [vmem:[#allocation5] sm:$0xf] }
 0x29d   :  { %v272_v63 = vunpack.c.l.bf16 %v271_v61 }
 0x29f   :  { %339 = vrot.lane.b32.xlu2 %v272_v63, %s1211_s22  ;;  %v278_v2 = vsub.f32 %v277_v0, %v272_v63 }
 0x2a1   :  { %279 = vst.msk [vmem:[#allocation6] sm:$0xff] %vm34_vm0, %v278_v2  ;;  %vm280_vm9 = vcmp.gt.f32.partialorder %v278_v2, 1.0 }
 0x2a2   :  { %v1116_v3 = vsel %vm280_vm9, 1.0, %v1209_v1 }
 0x2a3   :  { %v283_v4 = vpack.c.bf16 %v1116_v3, %v1116_v3 }
 0x2a5   :  { %284 = vst.msk [vmem:[#allocation5] sm:$0xf] %vm162_vm4, %v283_v4 }
 0x2a8   :  { %v359_v38 = vld [vmem:[#allocation6] sm:$0xff] }
 0x2a9   :  { %v360_v39 = vmul.f32 0.9, %v359_v38 }
 0x2ab   :  { %v361_v43 = vadd.f32 %v360_v39, %v358_v41 }
 0x2ac   :  { %v285_v10 = vld [vmem:[#allocation5] sm:$0xf] }
 0x2ad   :  { %1117 = vmatmul.msk.bf16.vlgmr.msrb.gmra.mxu3 %vm189_vm5, %v285_v10 }
 0x2ae   :  { %545 = vmatpush.bf16.msrb.mxu3 %v1280_v5 }
 0x2b2   :  { %546 = vmatpush.bf16.msrb.mxu3 %v1288_v6 }
 0x2b6   :  { %547 = vmatpush.bf16.msrb.mxu3 %v1296_v7 }
 0x2ba   :  { %548 = vmatpush.bf16.msrb.mxu3 %v1302_v8 }
 0x2f9   :  { %v340_v31 = vpop.permute.xlu2 %339 }
 0x330   :  { %v298_v15 = vpop.f32.mrf.mxu3 }
 0x331   :  { %306 = vrot.lane.b32.xlu1 %v298_v15, %s1211_s22  ;;  %v302_v25 = vadd.f32 %v1367_v45, %v298_v15 }
 0x333   :  { %v336_v27 = vadd.f32 %v335_v26, %v302_v25 }
 0x338   :  { %v300_v16 = vpop.f32.mrf.mxu3 }
 0x339   :  { %v442_v16 = vld [vmem:[#allocation2 + $0x18] sm:$0xff] }
 0x3a3   :  { %v307_v19 = vpop.permute.xlu1 %306 }
 0x3a4   :  { %v309_v20 = vadd.f32 %v307_v19, %v304_v18 }
 0x3a6   :  { %v311_v22 = vsub.f32 %v309_v20, %v310_v21 }
 0x3a8   :  { %312 = vst.msk [vmem:[#allocation8] sm:$0xff] %vm34_vm0, %v311_v22  ;;  %vm313_vm10 = vcmp.gt.f32.partialorder %v311_v22, 1.0 }
 0x3a9   :  { %v1118_v23 = vsel %vm313_vm10, 1.0, %v1209_v1 }
 0x3aa   :  { %316 = vst.msk [vmem:[#allocation9] sm:$0xff] %vm34_vm0, %v1118_v23  ;;  %v317_v9 = vpack.c.bf16 %v1118_v23, %v1118_v23 }
 0x3ac   :  { %1119 = vmatmul.msk.bf16.vlgmr.msra.gmra.mxu2 %vm34_vm0, %v317_v9 }
 0x3ad   :  { %579 = vmatpush.bf16.msra.mxu2 %v1336_v29 }
 0x3af   :  { %v387_v51 = vld [vmem:[#allocation8] sm:$0xff] }
 0x3b0   :  { %v388_v52 = vmul.f32 0.85, %v387_v51 }
 0x3b1   :  { %580 = vmatpush.bf16.msra.mxu2 %v1346_v32  ;;  %v394_v55 = vld [vmem:[#allocation9] sm:$0xff] }
 0x42f   :  { %v330_v28 = vpop.f32.mrf.mxu2 }
 0x430   :  { %v337_v30 = vsub.f32 %v336_v27, %v330_v28 }
 0x432   :  { %v342_v33 = vsub.f32 %v337_v30, %v340_v31 }
 0x434   :  { %343 = vst.msk [vmem:[#allocation7] sm:$0xff] %vm34_vm0, %v342_v33  ;;  %vm344_vm11 = vcmp.gt.f32.partialorder %v342_v33, 1.0 }
 0x435   :  { %v1120_v34 = vsel %vm344_vm11, 1.0, %v1209_v1 }
 0x436   :  { %v349_v35 = vpack.c.bf16 %v1120_v34, %v1120_v34  ;;  %348 = vst.msk [vmem:[#allocation4 + $0x8] sm:$0xff] %vm34_vm0, %v1120_v34 }
 0x437   :  { %v332_v36 = vpop.f32.mrf.mxu2 }
 0x438   :  { %351 = vrot.lane.b32.xlu2 %v349_v35, %s1212_s4 }
 0x43b   :  { %v418_v59 = vld [vmem:[#allocation7] sm:$0xff] }
 0x43c   :  { %v419_v61 = vmul.f32 0.9, %v418_v59 }
 0x492   :  { %v352_v37 = vpop.permute.xlu2 %351 }
 0x493   :  { %354 = vst.msk [vmem:[#allocation5] sm:$0xf] %vm269_vm8, %v352_v37 }
 0x49a   :  { %v355_v40 = vld [vmem:[#allocation5] sm:$0xf] }
 0x49b   :  { %v356_v42 = vunpack.c.l.bf16 %v355_v40 }
 0x49d   :  { %423 = vrot.lane.b32.xlu1 %v356_v42, %s1211_s22  ;;  %v362_v44 = vsub.f32 %v361_v43, %v356_v42 }
 0x49f   :  { %363 = vst.msk [vmem:[#allocation6] sm:$0xff] %vm34_vm0, %v362_v44  ;;  %vm364_vm12 = vcmp.gt.f32.partialorder %v362_v44, 1.0 }
 0x4a0   :  { %v1121_v46 = vsel %vm364_vm12, 1.0, %v1209_v1 }
 0x4a1   :  { %v367_v47 = vpack.c.bf16 %v1121_v46, %v1121_v46  ;;  %v526_v46 = vld [vmem:[#allocation2 + $0x20] sm:$0xff] }
 0x4a3   :  { %368 = vst.msk [vmem:[#allocation5] sm:$0xf] %vm162_vm4, %v367_v47 }
 0x4a6   :  { %v443_v13 = vld [vmem:[#allocation6] sm:$0xff] }
 0x4a7   :  { %v444_v14 = vmul.f32 0.9, %v443_v13 }
 0x4a9   :  { %v445_v18 = vadd.f32 %v444_v14, %v442_v16 }
 0x4aa   :  { %v369_v48 = vld [vmem:[#allocation5] sm:$0xf] }
 0x4ab   :  { %1122 = vmatmul.msk.bf16.vlgmr.msra.gmra.mxu1 %vm189_vm5, %v369_v48 }
 0x4ac   :  { %629 = vmatpush.bf16.msra.mxu1 %v1280_v5 }
 0x4b0   :  { %630 = vmatpush.bf16.msra.mxu1 %v1288_v6 }
 0x4b4   :  { %631 = vmatpush.bf16.msra.mxu1 %v1296_v7 }
 0x4b8   :  { %632 = vmatpush.bf16.msra.mxu1 %v1302_v8 }
 0x50f   :  { %v424_v2 = vpop.permute.xlu1 %423 }
 0x528   :  { %v382_v49 = vpop.f32.mrf.mxu1 }
 0x529   :  { %390 = vrot.lane.b32.xlu0 %v382_v49, %s1211_s22  ;;  %v386_v60 = vadd.f32 %v1367_v45, %v382_v49 }
 0x52b   :  { %v420_v62 = vadd.f32 %v419_v61, %v386_v60 }
 0x530   :  { %v384_v50 = vpop.f32.mrf.mxu1 }
 0x59b   :  { %v391_v53 = vpop.permute.xlu0 %390 }
 0x59c   :  { %v393_v54 = vadd.f32 %v391_v53, %v388_v52 }
 0x59e   :  { %v395_v56 = vsub.f32 %v393_v54, %v394_v55 }
 0x5a0   :  { %396 = vst.msk [vmem:[#allocation8] sm:$0xff] %vm34_vm0, %v395_v56  ;;  %vm397_vm13 = vcmp.gt.f32.partialorder %v395_v56, 1.0 }
 0x5a1   :  { %v1123_v57 = vsel %vm397_vm13, 1.0, %v1209_v1  ;;  %vm39_vm13 = vcmask 64512  }
 0x5a2   :  { %400 = vst.msk [vmem:[#allocation9] sm:$0xff] %vm34_vm0, %v1123_v57  ;;  %v401_v58 = vpack.c.bf16 %v1123_v57, %v1123_v57 }
 0x5a3   :  { %40 = vst.msk [vmem:[#allocation10] sm:$0xff] %vm39_vm13, %v1209_v1 }
 0x5a4   :  { %1124 = vmatmul.msk.bf16.vlgmr.msra.gmra.mxu3 %vm34_vm0, %v401_v58 }
 0x5a5   :  { %663 = vmatpush.bf16.msra.mxu3 %v1336_v29 }
 0x5a7   :  { %v471_v24 = vld [vmem:[#allocation8] sm:$0xff] }
 0x5a8   :  { %v472_v25 = vmul.f32 0.85, %v471_v24 }
 0x5a9   :  { %664 = vmatpush.bf16.msra.mxu3 %v1346_v32  ;;  %v478_v28 = vld [vmem:[#allocation9] sm:$0xff] }
 0x627   :  { %v414_v63 = vpop.f32.mrf.mxu3 }
 0x628   :  { %v421_v0 = vsub.f32 %v420_v62, %v414_v63 }
 0x62a   :  { %v426_v3 = vsub.f32 %v421_v0, %v424_v2 }
 0x62c   :  { %427 = vst.msk [vmem:[#allocation7] sm:$0xff] %vm34_vm0, %v426_v3  ;;  %vm428_vm14 = vcmp.gt.f32.partialorder %v426_v3, 1.0 }
 0x62d   :  { %v1125_v4 = vsel %vm428_vm14, 1.0, %v1209_v1 }
 0x62e   :  { %v433_v10 = vpack.c.bf16 %v1125_v4, %v1125_v4  ;;  %432 = vst.msk [vmem:[#allocation4 + $0x10] sm:$0xff] %vm34_vm0, %v1125_v4 }
 0x62f   :  { %v416_v11 = vpop.f32.mrf.mxu3 }
 0x630   :  { %435 = vrot.lane.b32.xlu2 %v433_v10, %s1212_s4 }
 0x633   :  { %v502_v34 = vld [vmem:[#allocation7] sm:$0xff] }
 0x634   :  { %v503_v36 = vmul.f32 0.9, %v502_v34 }
 0x68a   :  { %v436_v12 = vpop.permute.xlu2 %435 }
 0x68b   :  { %438 = vst.msk [vmem:[#allocation5] sm:$0xf] %vm269_vm8, %v436_v12 }
 0x692   :  { %v439_v15 = vld [vmem:[#allocation5] sm:$0xf] }
 0x693   :  { %v440_v17 = vunpack.c.l.bf16 %v439_v15 }
 0x695   :  { %507 = vrot.lane.b32.xlu1 %v440_v17, %s1211_s22  ;;  %v446_v19 = vsub.f32 %v445_v18, %v440_v17  ;;  %v610_v18 = vld [vmem:[#allocation2 + $0x28] sm:$0xff] }
 0x697   :  { %447 = vst.msk [vmem:[#allocation6] sm:$0xff] %vm34_vm0, %v446_v19  ;;  %vm448_vm15 = vcmp.gt.f32.partialorder %v446_v19, 1.0 }
 0x698   :  { %v1126_v20 = vsel %vm448_vm15, 1.0, %v1209_v1 }
 0x699   :  { %v451_v21 = vpack.c.bf16 %v1126_v20, %v1126_v20 }
 0x69b   :  { %452 = vst.msk [vmem:[#allocation5] sm:$0xf] %vm162_vm4, %v451_v21 }
 0x6a2   :  { %v453_v22 = vld [vmem:[#allocation5] sm:$0xf] }
 0x6a3   :  { %1127 = vmatmul.msk.bf16.vlgmr.msrb.gmra.mxu2 %vm189_vm5, %v453_v22 }
 0x6a4   :  { %747 = vmatpush.bf16.msrb.mxu2 %v1336_v29 }
 0x6a8   :  { %748 = vmatpush.bf16.msrb.mxu2 %v1346_v32 }
 0x707   :  { %v508_v40 = vpop.permute.xlu1 %507 }
 0x726   :  { %v466_v23 = vpop.f32.mrf.mxu2 }
 0x727   :  { %474 = vrot.lane.b32.xlu0 %v466_v23, %s1211_s22  ;;  %v470_v35 = vadd.f32 %v1367_v45, %v466_v23 }
 0x729   :  { %v504_v37 = vadd.f32 %v503_v36, %v470_v35 }
 0x72e   :  { %v468_v9 = vpop.f32.mrf.mxu2 }
 0x799   :  { %v475_v26 = vpop.permute.xlu0 %474 }
 0x79a   :  { %v477_v27 = vadd.f32 %v475_v26, %v472_v25 }
 0x79c   :  { %v479_v30 = vsub.f32 %v477_v27, %v478_v28 }
 0x79e   :  { %480 = vst.msk [vmem:[#allocation8] sm:$0xff] %vm34_vm0, %v479_v30  ;;  %vm481_vm1 = vcmp.gt.f32.partialorder %v479_v30, 1.0 }
 0x79f   :  { %v1128_v31 = vsel %vm481_vm1, 1.0, %v1209_v1 }
 0x7a0   :  { %484 = vst.msk [vmem:[#allocation9] sm:$0xff] %vm34_vm0, %v1128_v31  ;;  %v485_v33 = vpack.c.bf16 %v1128_v31, %v1128_v31 }
 0x7a2   :  { %1129 = vmatmul.msk.bf16.vlgmr.msrb.gmra.mxu1 %vm34_vm0, %v485_v33 }
 0x7a3   :  { %797 = vmatpush.bf16.msrb.mxu1 %v1280_v5 }
 0x7a5   :  { %v555_v55 = vld [vmem:[#allocation8] sm:$0xff] }
 0x7a6   :  { %v556_v56 = vmul.f32 0.85, %v555_v55 }
 0x7a7   :  { %798 = vmatpush.bf16.msrb.mxu1 %v1288_v6  ;;  %v562_v59 = vld [vmem:[#allocation9] sm:$0xff] }
 0x7ab   :  { %799 = vmatpush.bf16.msrb.mxu1 %v1296_v7 }
 0x7af   :  { %800 = vmatpush.bf16.msrb.mxu1 %v1302_v8  ;;  %v527_v8 = vld [vmem:[#allocation6] sm:$0xff] }
 0x7b0   :  { %v528_v43 = vmul.f32 0.9, %v527_v8 }
 0x7b2   :  { %v529_v48 = vadd.f32 %v528_v43, %v526_v46  ;;  %v1198_v43 = vld [vmem:[%s1616_s6 + $0x8] sm:$0xff] }
 0x7b3   :  { %909 = vmatpush.bf16.msra.mxu0 %v1198_v43 }
 0x81f   :  { %v498_v38 = vpop.f32.mrf.mxu1 }
 0x820   :  { %v505_v39 = vsub.f32 %v504_v37, %v498_v38 }
 0x822   :  { %v510_v41 = vsub.f32 %v505_v39, %v508_v40 }
 0x824   :  { %511 = vst.msk [vmem:[#allocation7] sm:$0xff] %vm34_vm0, %v510_v41  ;;  %vm512_vm2 = vcmp.gt.f32.partialorder %v510_v41, 1.0 }
 0x825   :  { %v1130_v5 = vsel %vm512_vm2, 1.0, %v1209_v1 }
 0x826   :  { %v517_v42 = vpack.c.bf16 %v1130_v5, %v1130_v5  ;;  %516 = vst.msk [vmem:[#allocation4 + $0x18] sm:$0xff] %vm34_vm0, %v1130_v5 }
 0x827   :  { %v500_v6 = vpop.f32.mrf.mxu1 }
 0x828   :  { %519 = vrot.lane.b32.xlu2 %v517_v42, %s1212_s4 }
 0x882   :  { %v520_v7 = vpop.permute.xlu2 %519 }
 0x883   :  { %522 = vst.msk [vmem:[#allocation5] sm:$0xf] %vm269_vm8, %v520_v7 }
 0x88a   :  { %v523_v44 = vld [vmem:[#allocation5] sm:$0xf] }
 0x88b   :  { %v524_v47 = vunpack.c.l.bf16 %v523_v44  ;;  %v1197_v44 = vld [vmem:[%s1616_s6] sm:$0xff] }
 0x88c   :  { %910 = vmatpush.bf16.msra.mxu0 %v1197_v44 }
 0x88d   :  { %591 = vrot.lane.b32.xlu1 %v524_v47, %s1211_s22  ;;  %v530_v49 = vsub.f32 %v529_v48, %v524_v47 }
 0x88f   :  { %531 = vst.msk [vmem:[#allocation6] sm:$0xff] %vm34_vm0, %v530_v49  ;;  %vm532_vm3 = vcmp.gt.f32.partialorder %v530_v49, 1.0 }
 0x890   :  { %v1131_v50 = vsel %vm532_vm3, 1.0, %v1209_v1 }
 0x891   :  { %v535_v51 = vpack.c.bf16 %v1131_v50, %v1131_v50  ;;  %v694_v50 = vld [vmem:[#allocation2 + $0x30] sm:$0xff] }
 0x893   :  { %536 = vst.msk [vmem:[#allocation5] sm:$0xf] %vm162_vm4, %v535_v51 }
 0x896   :  { %v611_v15 = vld [vmem:[#allocation6] sm:$0xff] }
 0x897   :  { %v612_v16 = vmul.f32 0.9, %v611_v15 }
 0x899   :  { %v613_v20 = vadd.f32 %v612_v16, %v610_v18 }
 0x89a   :  { %v537_v52 = vld [vmem:[#allocation5] sm:$0xf] }
 0x89b   :  { %1132 = vmatmul.msk.bf16.vlgmr.msrb.gmra.mxu3 %vm189_vm5, %v537_v52 }
 0x89c   :  { %831 = vmatpush.bf16.msrb.mxu3 %v1336_v29 }
 0x8a0   :  { %832 = vmatpush.bf16.msrb.mxu3 %v1346_v32  ;;  %v586_v32 = vld [vmem:[#allocation7] sm:$0xff] }
 0x8a1   :  { %v587_v63 = vmul.f32 0.9, %v586_v32 }
 0x8ff   :  { %v592_v4 = vpop.permute.xlu1 %591 }
 0x91e   :  { %v550_v53 = vpop.f32.mrf.mxu3 }
 0x91f   :  { %558 = vrot.lane.b32.xlu0 %v550_v53, %s1211_s22  ;;  %v554_v62 = vadd.f32 %v1367_v45, %v550_v53 }
 0x921   :  { %v588_v0 = vadd.f32 %v587_v63, %v554_v62 }
 0x926   :  { %v552_v54 = vpop.f32.mrf.mxu3 }
 0x991   :  { %v559_v57 = vpop.permute.xlu0 %558 }
 0x992   :  { %v561_v58 = vadd.f32 %v559_v57, %v556_v56  ;;  %v860_v57 = vld [vmem:[#allocation4 + $0x8] sm:$0xff] }
 0x994   :  { %v563_v60 = vsub.f32 %v561_v58, %v562_v59  ;;  %v859_v58 = vld [vmem:[#allocation4] sm:$0xff] }
 0x995   :  { %v867_v59 = vpack.c.bf16 %v860_v57, %v859_v58 }
 0x996   :  { %564 = vst.msk [vmem:[#allocation8] sm:$0xff] %vm34_vm0, %v563_v60  ;;  %vm565_vm6 = vcmp.gt.f32.partialorder %v563_v60, 1.0  ;;  %v862_v60 = vld [vmem:[#allocation4 + $0x18] sm:$0xff] }
 0x997   :  { %v1133_v61 = vsel %vm565_vm6, 1.0, %v1209_v1 }
 0x998   :  { %568 = vst.msk [vmem:[#allocation9] sm:$0xff] %vm34_vm0, %v1133_v61  ;;  %v569_v29 = vpack.c.bf16 %v1133_v61, %v1133_v61  ;;  %v861_v61 = vld [vmem:[#allocation4 + $0x10] sm:$0xff] }
 0x99a   :  { %1134 = vmatmul.msk.bf16.vlgmr.msra.gmra.mxu2 %vm34_vm0, %v569_v29  ;;  %v868_v29 = vpack.c.bf16 %v862_v60, %v861_v61 }
 0x99d   :  { %v639_v26 = vld [vmem:[#allocation8] sm:$0xff] }
 0x99e   :  { %v640_v27 = vmul.f32 0.85, %v639_v26 }
 0x99f   :  { %v646_v31 = vld [vmem:[#allocation9] sm:$0xff] }
 0xa1d   :  { %v582_v2 = vpop.f32.mrf.mxu2 }
 0xa1e   :  { %v589_v3 = vsub.f32 %v588_v0, %v582_v2 }
 0xa20   :  { %v594_v10 = vsub.f32 %v589_v3, %v592_v4  ;;  %v1508_v3 = vld [vmem:[%s1617_s7] ss:$0 sm:$0xff] }
 0xa22   :  { %595 = vst.msk [vmem:[#allocation7] sm:$0xff] %vm34_vm0, %v594_v10  ;;  %vm596_vm7 = vcmp.gt.f32.partialorder %v594_v10, 1.0 }
 0xa23   :  { %v1135_v11 = vsel %vm596_vm7, 1.0, %v1209_v1 }
 0xa24   :  { %v601_v12 = vpack.c.bf16 %v1135_v11, %v1135_v11  ;;  %600 = vst.msk [vmem:[#allocation4 + $0x20] sm:$0xff] %vm34_vm0, %v1135_v11  ;;  %v941_v11 = vld [vmem:[#allocation10] sm:$0xff] }
 0xa25   :  { %v584_v13 = vpop.f32.mrf.mxu2  ;;  %vm942_vm14 = vcmp.gt.f32.partialorder %v941_v11, 1.0 }
 0xa26   :  { %603 = vrot.lane.b32.xlu2 %v601_v12, %s1212_s4  ;;  %v945_v12 = vmul.f32 0.9, %v941_v11  ;;  %v1163_v15 = vsel %vm942_vm14, 1.0, %v1209_v1 }
 0xa29   :  { %v670_v36 = vld [vmem:[#allocation7] sm:$0xff] }
 0xa2a   :  { %v671_v38 = vmul.f32 0.9, %v670_v36 }
 0xa2b   :  { %v863_v62 = vld [vmem:[#allocation4 + $0x20] sm:$0xff] }
 0xa80   :  { %v604_v14 = vpop.permute.xlu2 %603 }
 0xa81   :  { %606 = vst.msk [vmem:[#allocation5] sm:$0xf] %vm269_vm8, %v604_v14 }
 0xa88   :  { %v607_v17 = vld [vmem:[#allocation5] sm:$0xf] }
 0xa89   :  { %v608_v19 = vunpack.c.l.bf16 %v607_v17 }
 0xa8b   :  { %675 = vrot.lane.b32.xlu1 %v608_v19, %s1211_s22  ;;  %v614_v21 = vsub.f32 %v613_v20, %v608_v19 }
 0xa8d   :  { %615 = vst.msk [vmem:[#allocation6] sm:$0xff] %vm34_vm0, %v614_v21  ;;  %vm616_vm9 = vcmp.gt.f32.partialorder %v614_v21, 1.0 }
 0xa8e   :  { %v1136_v22 = vsel %vm616_vm9, 1.0, %v1209_v1 }
 0xa8f   :  { %v619_v23 = vpack.c.bf16 %v1136_v22, %v1136_v22 }
 0xa91   :  { %620 = vst.msk [vmem:[#allocation5] sm:$0xf] %vm162_vm4, %v619_v23 }
 0xa94   :  { %v695_v47 = vld [vmem:[#allocation6] sm:$0xff] }
 0xa95   :  { %v696_v48 = vmul.f32 0.9, %v695_v47 }
 0xa97   :  { %v697_v52 = vadd.f32 %v696_v48, %v694_v50 }
 0xa98   :  { %v621_v9 = vld [vmem:[#allocation5] sm:$0xf] }
 0xa99   :  { %1137 = vmatmul.msk.bf16.vlgmr.msra.gmra.mxu1 %vm189_vm5, %v621_v9 }
 0xafd   :  { %v676_v5 = vpop.permute.xlu1 %675 }
 0xb16   :  { %v634_v24 = vpop.f32.mrf.mxu1 }
 0xb17   :  { %642 = vrot.lane.b32.xlu0 %v634_v24, %s1211_s22  ;;  %v638_v37 = vadd.f32 %v1367_v45, %v634_v24 }
 0xb19   :  { %v672_v39 = vadd.f32 %v671_v38, %v638_v37 }
 0xb1e   :  { %v636_v25 = vpop.f32.mrf.mxu1 }
 0xb89   :  { %v643_v28 = vpop.permute.xlu0 %642 }
 0xb8a   :  { %v645_v30 = vadd.f32 %v643_v28, %v640_v27 }
 0xb8c   :  { %v647_v33 = vsub.f32 %v645_v30, %v646_v31 }
 0xb8e   :  { %648 = vst.msk [vmem:[#allocation8] sm:$0xff] %vm34_vm0, %v647_v33  ;;  %vm649_vm10 = vcmp.gt.f32.partialorder %v647_v33, 1.0 }
 0xb8f   :  { %v1138_v34 = vsel %vm649_vm10, 1.0, %v1209_v1 }
 0xb90   :  { %652 = vst.msk [vmem:[#allocation9] sm:$0xff] %vm34_vm0, %v1138_v34  ;;  %v653_v35 = vpack.c.bf16 %v1138_v34, %v1138_v34 }
 0xb92   :  { %1139 = vmatmul.msk.bf16.vlgmr.msra.gmra.mxu3 %vm34_vm0, %v653_v35 }
 0xb95   :  { %v723_v61 = vld [vmem:[#allocation8] sm:$0xff] }
 0xc15   :  { %v666_v40 = vpop.f32.mrf.mxu3 }
 0xc16   :  { %v673_v41 = vsub.f32 %v672_v39, %v666_v40 }
 0xc18   :  { %v678_v42 = vsub.f32 %v673_v41, %v676_v5 }
 0xc1a   :  { %679 = vst.msk [vmem:[#allocation7] sm:$0xff] %vm34_vm0, %v678_v42  ;;  %vm680_vm11 = vcmp.gt.f32.partialorder %v678_v42, 1.0 }
 0xc1b   :  { %v1140_v6 = vsel %vm680_vm11, 1.0, %v1209_v1 }
 0xc1c   :  { %v685_v7 = vpack.c.bf16 %v1140_v6, %v1140_v6  ;;  %684 = vst.msk [vmem:[#allocation4 + $0x28] sm:$0xff] %vm34_vm0, %v1140_v6 }
 0xc1d   :  { %v668_v8 = vpop.f32.mrf.mxu3 }
 0xc1e   :  { %687 = vrot.lane.b32.xlu2 %v685_v7, %s1212_s4 }
 0xc21   :  { %v754_v11 = vld [vmem:[#allocation7] sm:$0xff] }
 0xc23   :  { %v864_v32 = vld [vmem:[#allocation4 + $0x28] sm:$0xff] }
 0xc24   :  { %v869_v63 = vpack.c.bf16 %v864_v32, %v863_v62 }
 0xc78   :  { %v688_v46 = vpop.permute.xlu2 %687 }
 0xc79   :  { %690 = vst.msk [vmem:[#allocation5] sm:$0xf] %vm269_vm8, %v688_v46 }
 0xc80   :  { %v691_v49 = vld [vmem:[#allocation5] sm:$0xf] }
 0xc81   :  { %v692_v51 = vunpack.c.l.bf16 %v691_v49 }
 0xc83   :  { %759 = vrot.lane.b32.xlu1 %v692_v51, %s1211_s22  ;;  %v698_v53 = vsub.f32 %v697_v52, %v692_v51 }
 0xc85   :  { %699 = vst.msk [vmem:[#allocation6] sm:$0xff] %vm34_vm0, %v698_v53  ;;  %vm700_vm12 = vcmp.gt.f32.partialorder %v698_v53, 1.0 }
 0xc86   :  { %v1141_v54 = vsel %vm700_vm12, 1.0, %v1209_v1 }
 0xc87   :  { %v703_v55 = vpack.c.bf16 %v1141_v54, %v1141_v54 }
 0xc89   :  { %704 = vst.msk [vmem:[#allocation5] sm:$0xf] %vm162_vm4, %v703_v55 }
 0xc90   :  { %v705_v56 = vld [vmem:[#allocation5] sm:$0xf] }
 0xc91   :  { %1142 = vmatmul.msk.bf16.vlgmr.msrb.gmra.mxu0 %vm189_vm5, %v705_v56 }
 0xca1   :  { %1159 = vmatmul.msk.bf16.vlgmr.msra.gmra.mxu0 %vm34_vm0, %v867_v59 }
 0xcb1   :  { %1160 = vmatmul.msk.bf16.gmra.mxu0 %vm34_vm0, %v868_v29  ;;  %v724_v29 = vmul.f32 0.85, %v723_v61 }
 0xcc1   :  { %1161 = vmatmul.msk.bf16.gmra.mxu0 %vm34_vm0, %v869_v63  ;;  %v730_v63 = vld [vmem:[#allocation9] sm:$0xff] }
 0xd0e   :  { %v1501_v0 = vpop.f32.mrf.mxu0 }
 0xd0f   :  { %726 = vrot.lane.b32.xlu0 %v1501_v0, %s1211_s22 }
 0xd16   :  { %v720_v2 = vpop.f32.mrf.mxu0 }
 0xd1e   :  { %v912_v4 = vpop.f32.mrf.mxu0 }
 0xd1f   :  { %v913_v10 = vadd.f32 %v1508_v3, %v912_v4 }
 0xd21   :  { %933 = vst.msk [vmem:[#allocation3] sm:$0xff] %vm39_vm13, %v913_v10 }
 0xd26   :  { %v914_v13 = vpop.f32.mrf.mxu0 }
 0xd27   :  { %v915_v14 = vadd.f32 %v1508_v3, %v914_v13  ;;  %v755_v13 = vmul.f32 0.9, %v754_v11 }
 0xd28   :  { %v946_v16 = vld [vmem:[#allocation3] sm:$0xff] }
 0xd29   :  { %v947_v17 = vadd.f32 %v946_v16, %v945_v12  ;;  %934 = vst.msk [vmem:[#allocation3 + $0x8] sm:$0xff] %vm39_vm13, %v915_v14  ;;  %v722_v12 = vadd.f32 %v1367_v45, %v1501_v0  ;;  %v779_v0 = vld [vmem:[#allocation6] sm:$0xff] }
 0xd2b   :  { %v948_v18 = vsub.f32 %v947_v17, %v1163_v15  ;;  %v756_v14 = vadd.f32 %v755_v13, %v722_v12  ;;  %v760_v17 = vpop.permute.xlu1 %759 }
 0xd2d   :  { %949 = vst.msk [vmem:[#allocation10] sm:$0xff] %vm39_vm13, %v948_v18  ;;  %vm950_vm15 = vcmp.gt.f32.partialorder %v948_v18, 1.0 }
 0xd2e   :  { %v1164_v19 = vsel %vm950_vm15, 1.0, %v1209_v1  ;;  %v917_v20 = vpop.f32.mrf.mxu0 }
 0xd2f   :  { %953 = vst.msk [vmem:[%s1618_s8] sm:$0xff] %vm39_vm13, %v1164_v19  ;;  %v918_v21 = vadd.f32 %v1508_v3, %v917_v20 }
 0xd30   :  { %v960_v9 = vld [vmem:[#allocation3 + $0x8] sm:$0xff] }
 0xd31   :  { %935 = vst.msk [vmem:[#allocation3 + $0x10] sm:$0xff] %vm39_vm13, %v918_v21 }
 0xd34   :  { %v954_v22 = vld [vmem:[#allocation10] sm:$0xff] }
 0xd35   :  { %vm955_vm1 = vcmp.gt.f32.partialorder %v954_v22, 1.0  ;;  %v958_v23 = vmul.f32 0.9, %v954_v22 }
 0xd36   :  { %v919_v24 = vpop.f32.mrf.mxu0  ;;  %v1165_v27 = vsel %vm955_vm1, 1.0, %v1209_v1 }
 0xd37   :  { %v961_v25 = vadd.f32 %v960_v9, %v958_v23  ;;  %v920_v26 = vadd.f32 %v1508_v3, %v919_v24  ;;  %v780_v23 = vmul.f32 0.9, %v779_v0  ;;  %v778_v24 = vld [vmem:[#allocation2 + $0x38] sm:$0xff] }
 0xd38   :  { %v975_v36 = vld [vmem:[#allocation3 + $0x10] sm:$0xff] }
 0xd39   :  { %v962_v28 = vsub.f32 %v961_v25, %v1165_v27  ;;  %936 = vst.msk [vmem:[#allocation3 + $0x18] sm:$0xff] %vm39_vm13, %v920_v26  ;;  %v781_v26 = vadd.f32 %v780_v23, %v778_v24 }
 0xd3b   :  { %963 = vst.msk [vmem:[#allocation10] sm:$0xff] %vm39_vm13, %v962_v28  ;;  %vm964_vm2 = vcmp.gt.f32.partialorder %v962_v28, 1.0 }
 0xd3c   :  { %v1166_v30 = vsel %vm964_vm2, 1.0, %v1209_v1 }
 0xd3d   :  { %1167 = vst.msk [vmem:[%s1618_s8 + $0x8] sm:$0xff] %vm39_vm13, %v1166_v30 }
 0xd3e   :  { %v922_v31 = vpop.f32.mrf.mxu0 }
 0xd3f   :  { %v923_v33 = vadd.f32 %v1508_v3, %v922_v31 }
 0xd40   :  { %v990_v7 = vld [vmem:[#allocation3 + $0x18] sm:$0xff] }
 0xd41   :  { %937 = vst.msk [vmem:[#allocation3 + $0x20] sm:$0xff] %vm39_vm13, %v923_v33 }
 0xd42   :  { %v969_v34 = vld [vmem:[#allocation10] sm:$0xff] }
 0xd43   :  { %vm970_vm3 = vcmp.gt.f32.partialorder %v969_v34, 1.0  ;;  %v973_v35 = vmul.f32 0.9, %v969_v34 }
 0xd44   :  { %v1168_v38 = vsel %vm970_vm3, 1.0, %v1209_v1 }
 0xd45   :  { %v976_v37 = vadd.f32 %v975_v36, %v973_v35 }
 0xd46   :  { %v924_v39 = vpop.f32.mrf.mxu0 }
 0xd47   :  { %v977_v40 = vsub.f32 %v976_v37, %v1168_v38  ;;  %v925_v41 = vadd.f32 %v1508_v3, %v924_v39 }
 0xd48   :  { %v1005_v49 = vld [vmem:[#allocation3 + $0x20] sm:$0xff] }
 0xd49   :  { %978 = vst.msk [vmem:[#allocation10] sm:$0xff] %vm39_vm13, %v977_v40  ;;  %vm979_vm6 = vcmp.gt.f32.partialorder %v977_v40, 1.0 }
 0xd4a   :  { %v1169_v5 = vsel %vm979_vm6, 1.0, %v1209_v1  ;;  %938 = vst.msk [vmem:[#allocation3 + $0x28] sm:$0xff] %vm39_vm13, %v925_v41 }
 0xd4b   :  { %1170 = vst.msk [vmem:[%s1618_s8 + $0x10] sm:$0xff] %vm39_vm13, %v1169_v5 }
 0xd50   :  { %v984_v42 = vld [vmem:[#allocation10] sm:$0xff] }
 0xd51   :  { %vm985_vm7 = vcmp.gt.f32.partialorder %v984_v42, 1.0  ;;  %v988_v6 = vmul.f32 0.9, %v984_v42  ;;  %v1020_v56 = vld [vmem:[#allocation3 + $0x28] sm:$0xff] }
 0xd52   :  { %v1171_v43 = vsel %vm985_vm7, 1.0, %v1209_v1 }
 0xd53   :  { %v991_v8 = vadd.f32 %v990_v7, %v988_v6 }
 0xd55   :  { %v992_v44 = vsub.f32 %v991_v8, %v1171_v43 }
 0xd57   :  { %993 = vst.msk [vmem:[#allocation10] sm:$0xff] %vm39_vm13, %v992_v44  ;;  %vm994_vm9 = vcmp.gt.f32.partialorder %v992_v44, 1.0 }
 0xd58   :  { %v1172_v46 = vsel %vm994_vm9, 1.0, %v1209_v1 }
 0xd59   :  { %1173 = vst.msk [vmem:[%s1618_s8 + $0x18] sm:$0xff] %vm39_vm13, %v1172_v46 }
 0xd5e   :  { %v999_v47 = vld [vmem:[#allocation10] sm:$0xff] }
 0xd5f   :  { %vm1000_vm10 = vcmp.gt.f32.partialorder %v999_v47, 1.0  ;;  %v1003_v48 = vmul.f32 0.9, %v999_v47 }
 0xd60   :  { %v1174_v51 = vsel %vm1000_vm10, 1.0, %v1209_v1 }
 0xd61   :  { %v1006_v50 = vadd.f32 %v1005_v49, %v1003_v48 }
 0xd63   :  { %v1007_v52 = vsub.f32 %v1006_v50, %v1174_v51 }
 0xd65   :  { %1008 = vst.msk [vmem:[#allocation10] sm:$0xff] %vm39_vm13, %v1007_v52  ;;  %vm1009_vm11 = vcmp.gt.f32.partialorder %v1007_v52, 1.0 }
 0xd66   :  { %v1175_v53 = vsel %vm1009_vm11, 1.0, %v1209_v1 }
 0xd67   :  { %1176 = vst.msk [vmem:[%s1618_s8 + $0x20] sm:$0xff] %vm39_vm13, %v1175_v53 }
 0xd6c   :  { %v1014_v54 = vld [vmem:[#allocation10] sm:$0xff] }
 0xd6d   :  { %vm1015_vm12 = vcmp.gt.f32.partialorder %v1014_v54, 1.0  ;;  %v1018_v55 = vmul.f32 0.9, %v1014_v54 }
 0xd6e   :  { %v1177_v58 = vsel %vm1015_vm12, 1.0, %v1209_v1 }
 0xd6f   :  { %v1021_v57 = vadd.f32 %v1020_v56, %v1018_v55 }
 0xd71   :  { %v1022_v59 = vsub.f32 %v1021_v57, %v1177_v58 }
 0xd73   :  { %1023 = vst.msk [vmem:[#allocation10] sm:$0xff] %vm39_vm13, %v1022_v59  ;;  %vm1024_vm14 = vcmp.gt.f32.partialorder %v1022_v59, 1.0 }
 0xd74   :  { %v1178_v60 = vsel %vm1024_vm14, 1.0, %v1209_v1 }
 0xd75   :  { %1179 = vst.msk [vmem:[%s1618_s8 + $0x28] sm:$0xff] %vm39_vm13, %v1178_v60 }
 0xd7a   :  { %v1029_v56 = vld [vmem:[#allocation10] sm:$0xff] }
 0xd7b   :  { %v1033_v58 = vmul.f32 0.9, %v1029_v56 }
 0xd81   :  { %v727_v32 = vpop.permute.xlu0 %726 }
 0xd82   :  { %v729_v62 = vadd.f32 %v727_v32, %v724_v29 }
 0xd84   :  { %v731_v2 = vsub.f32 %v729_v62, %v730_v63 }
 0xd86   :  { %732 = vst.msk [vmem:[#allocation8] sm:$0xff] %vm34_vm0, %v731_v2  ;;  %vm733_vm15 = vcmp.gt.f32.partialorder %v731_v2, 1.0 }
 0xd87   :  { %v1143_v4 = vsel %vm733_vm15, 1.0, %v1209_v1 }
 0xd88   :  { %736 = vst.msk [vmem:[#allocation9] sm:$0xff] %vm34_vm0, %v1143_v4  ;;  %v737_v10 = vpack.c.bf16 %v1143_v4, %v1143_v4 }
 0xd8a   :  { %1144 = vmatmul.msk.bf16.vlgmr.msrb.gmra.mxu2 %vm34_vm0, %v737_v10 }
 0xd8d   :  { %v807_v35 = vld [vmem:[#allocation8] sm:$0xff] }
 0xd8e   :  { %v808_v36 = vmul.f32 0.85, %v807_v35 }
 0xd8f   :  { %v814_v39 = vld [vmem:[#allocation9] sm:$0xff] }
 0xe0d   :  { %v750_v15 = vpop.f32.mrf.mxu2 }
 0xe0e   :  { %v757_v16 = vsub.f32 %v756_v14, %v750_v15 }
 0xe10   :  { %v762_v18 = vsub.f32 %v757_v16, %v760_v17 }
 0xe12   :  { %763 = vst.msk [vmem:[#allocation7] sm:$0xff] %vm34_vm0, %v762_v18  ;;  %vm764_vm1 = vcmp.gt.f32.partialorder %v762_v18, 1.0 }
 0xe13   :  { %v1145_v19 = vsel %vm764_vm1, 1.0, %v1209_v1 }
 0xe14   :  { %v769_v20 = vpack.c.bf16 %v1145_v19, %v1145_v19  ;;  %768 = vst.msk [vmem:[#allocation4 + $0x30] sm:$0xff] %vm34_vm0, %v1145_v19 }
 0xe15   :  { %v752_v21 = vpop.f32.mrf.mxu2 }
 0xe16   :  { %771 = vrot.lane.b32.xlu2 %v769_v20, %s1212_s4 }
 0xe19   :  { %v838_v42 = vld [vmem:[#allocation7] sm:$0xff] }
 0xe1a   :  { %v839_v7 = vmul.f32 0.9, %v838_v42 }
 0xe1b   :  { %v865_v51 = vld [vmem:[#allocation4 + $0x30] sm:$0xff] }
 0xe70   :  { %v772_v22 = vpop.permute.xlu2 %771 }
 0xe71   :  { %774 = vst.msk [vmem:[#allocation5] sm:$0xf] %vm269_vm8, %v772_v22 }
 0xe78   :  { %v775_v9 = vld [vmem:[#allocation5] sm:$0xf] }
 0xe79   :  { %v776_v25 = vunpack.c.l.bf16 %v775_v9 }
 0xe7b   :  { %843 = vrot.lane.b32.xlu1 %v776_v25, %s1211_s22  ;;  %v782_v27 = vsub.f32 %v781_v26, %v776_v25 }
 0xe7d   :  { %783 = vst.msk [vmem:[#allocation6] sm:$0xff] %vm34_vm0, %v782_v27  ;;  %vm784_vm2 = vcmp.gt.f32.partialorder %v782_v27, 1.0 }
 0xe7e   :  { %v1146_v28 = vsel %vm784_vm2, 1.0, %v1209_v1 }
 0xe7f   :  { %v787_v30 = vpack.c.bf16 %v1146_v28, %v1146_v28 }
 0xe81   :  { %788 = vst.msk [vmem:[#allocation5] sm:$0xf] %vm162_vm4, %v787_v30 }
 0xe88   :  { %v789_v31 = vld [vmem:[#allocation5] sm:$0xf] }
 0xe89   :  { %1147 = vmatmul.msk.bf16.vlgmr.msrb.gmra.mxu1 %vm189_vm5, %v789_v31  ;;  %vm1030_vm5 = vcmp.gt.f32.partialorder %v1029_v56, 1.0 }
 0xe8a   :  { %v1180_v29 = vsel %vm1030_vm5, 1.0, %v1209_v1 }
 0xeed   :  { %v844_v46 = vpop.permute.xlu1 %843 }
 0xf06   :  { %v802_v33 = vpop.f32.mrf.mxu1 }
 0xf07   :  { %810 = vrot.lane.b32.xlu0 %v802_v33, %s1211_s22  ;;  %v806_v6 = vadd.f32 %v1367_v45, %v802_v33 }
 0xf09   :  { %v840_v8 = vadd.f32 %v839_v7, %v806_v6 }
 0xf0e   :  { %v804_v34 = vpop.f32.mrf.mxu1 }
 0xf79   :  { %v811_v37 = vpop.permute.xlu0 %810 }
 0xf7a   :  { %v813_v38 = vadd.f32 %v811_v37, %v808_v36 }
 0xf7c   :  { %v815_v40 = vsub.f32 %v813_v38, %v814_v39 }
 0xf7e   :  { %816 = vst.msk [vmem:[#allocation8] sm:$0xff] %vm34_vm0, %v815_v40  ;;  %vm817_vm3 = vcmp.gt.f32.partialorder %v815_v40, 1.0 }
 0xf7f   :  { %v1148_v41 = vsel %vm817_vm3, 1.0, %v1209_v1 }
 0xf80   :  { %820 = vst.msk [vmem:[#allocation9] sm:$0xff] %vm34_vm0, %v1148_v41  ;;  %v821_v5 = vpack.c.bf16 %v1148_v41, %v1148_v41 }
 0xf82   :  { %1149 = vmatmul.msk.bf16.vlgmr.msrb.gmra.mxu3 %vm34_vm0, %v821_v5 }
0x1005   :  { %v834_v43 = vpop.f32.mrf.mxu3 }
0x1006   :  { %v841_v44 = vsub.f32 %v840_v8, %v834_v43 }
0x1008   :  { %v846_v47 = vsub.f32 %v841_v44, %v844_v46 }
0x100a   :  { %847 = vst.msk [vmem:[#allocation7] sm:$0xff] %vm34_vm0, %v846_v47  ;;  %vm848_vm4 = vcmp.gt.f32.partialorder %v846_v47, 1.0 }
0x100b   :  { %v1150_v48 = vsel %vm848_vm4, 1.0, %v1209_v1 }
0x100c   :  { %v853_v49 = vpack.c.bf16 %v1150_v48, %v1150_v48  ;;  %852 = vst.msk [vmem:[#allocation4 + $0x38] sm:$0xff] %vm34_vm0, %v1150_v48 }
0x100d   :  { %v836_v50 = vpop.f32.mrf.mxu3 }
0x100e   :  { %855 = vrot.lane.b32.xlu2 %v853_v49, %s1212_s4 }
0x1013   :  { %v866_v52 = vld [vmem:[#allocation4 + $0x38] sm:$0xff] }
0x1014   :  { %v870_v45 = vpack.c.bf16 %v866_v52, %v865_v51 }
0x1016   :  { %1162 = vmatmul.msk.bf16.gmra.mxu0 %vm34_vm0, %v870_v45 }
0x1068   :  { %v856_v53 = vpop.permute.xlu2 %855 }
0x1069   :  { %858 = vst.msk [vmem:[#allocation5] sm:$0xf] %vm269_vm8, %v856_v53 }
0x1093   :  { %v927_v54 = vpop.f32.mrf.mxu0 }
0x1094   :  { %v928_v55 = vadd.f32 %v1508_v3, %v927_v54 }
0x1096   :  { %939 = vst.msk [vmem:[#allocation3 + $0x30] sm:$0xff] %vm39_vm13, %v928_v55 }
0x109b   :  { %v929_v57 = vpop.f32.mrf.mxu0 }
0x109c   :  { %v930_v59 = vadd.f32 %v1508_v3, %v929_v57 }
0x109d   :  { %v1035_v60 = vld [vmem:[#allocation3 + $0x30] sm:$0xff] }
0x109e   :  { %v1036_v61 = vadd.f32 %v1035_v60, %v1033_v58  ;;  %940 = vst.msk [vmem:[#allocation3 + $0x38] sm:$0xff] %vm39_vm13, %v930_v59 }
0x10a0   :  { %v1037_v32 = vsub.f32 %v1036_v61, %v1180_v29 }
0x10a2   :  { %1038 = vst.msk [vmem:[#allocation10] sm:$0xff] %vm39_vm13, %v1037_v32  ;;  %vm1039_vm0 = vcmp.gt.f32.partialorder %v1037_v32, 1.0 }
0x10a3   :  { %v1181_v62 = vsel %vm1039_vm0, 1.0, %v1209_v1 }
0x10a4   :  { %1182 = vst.msk [vmem:[%s1618_s8 + $0x30] sm:$0xff] %vm39_vm13, %v1181_v62 }
0x10a5   :  { %v1050_v2 = vld [vmem:[#allocation3 + $0x38] sm:$0xff] }
0x10a9   :  { %v1044_v63 = vld [vmem:[#allocation10] sm:$0xff] }
0x10aa   :  { %vm1045_vm8 = vcmp.gt.f32.partialorder %v1044_v63, 1.0  ;;  %v1048_v3 = vmul.f32 0.9, %v1044_v63 }
0x10ab   :  { %v1183_v10 = vsel %vm1045_vm8, 1.0, %v1209_v1 }
0x10ac   :  { %v1051_v4 = vadd.f32 %v1050_v2, %v1048_v3 }
0x10ae   :  { %v1052_v11 = vsub.f32 %v1051_v4, %v1183_v10 }
0x10b0   :  { %1053 = vst.msk [vmem:[#allocation10] sm:$0xff] %vm39_vm13, %v1052_v11  ;;  %vm1054_vm6 = vcmp.gt.f32.partialorder %v1052_v11, 1.0 }
0x10b1   :  { %v1184_v12 = vsel %vm1054_vm6, 1.0, %v1209_v1 }
0x10b2   :  { %1185 = vst.msk [vmem:[%s1618_s8 + $0x38] sm:$0xff] %vm39_vm13, %v1184_v12 }

</bundles_post_ra>
